<compile_context>
chip_gen: v7x
topology: tpu7x:2x2x1
jax: 0.10.0
libtpu: 0.0.40
codegen_flags: <defaults>
</compile_context>

<pallas_src>
import jax
import jax.numpy as jnp
from jax import lax
from jax.experimental import pallas as pl
from jax.experimental.pallas import tpu as pltpu


# --------------------------------- kernel -----------------------------------
def _lstm_tagger_kernel(sent_ref, ptabf_ref, ptabb_ref, whh2_ref, wtag_ref, btag_ref,
                        out_ref, hbuf_ref):
    S = out_ref.shape[0]
    H2 = whh2_ref.shape[0]        # 2*H_pad : fused state width (multiple of 128 lanes)
    Hp = H2 // 2                  # per-direction (padded) hidden width

    whh2 = whh2_ref[...]          # (2*H_pad, 8*H_pad) loop-invariant recurrent weight

    # Fused, fully-unrolled bidirectional recurrence.  Gate layout along 8*H_pad is
    # [i_f i_b | f_f f_b | g_f g_b | o_f o_b]; each gate is one 128-lane slice acting
    # on the fused state [h_fwd | h_bwd].
    h = jnp.zeros((1, H2), jnp.float32)
    c = jnp.zeros((1, H2), jnp.float32)
    for j in range(S):
        # Token-id reads from SMEM (scalar prefetch) + precomputed, bias-folded input
        # projections for step j of both directions.  Independent of h/c, so these
        # dynamic-row loads sit off the serial critical path.
        tf = sent_ref[j]                      # forward  direction token at time j
        tb = sent_ref[S - 1 - j]              # backward direction token at time S-1-j
        xproj = ptabf_ref[tf] + ptabb_ref[tb]                      # (1, 8*H_pad)

        g = xproj + jnp.dot(h, whh2, preferred_element_type=jnp.float32)
        i_g = jax.nn.sigmoid(g[:, 0 * H2:1 * H2])   # one aligned vreg slice per gate;
        f_g = jax.nn.sigmoid(g[:, 1 * H2:2 * H2])   # sigmoid only on i/f/o,
        g_g = jnp.tanh(g[:, 2 * H2:3 * H2])         # tanh only on g
        o_g = jax.nn.sigmoid(g[:, 3 * H2:4 * H2])
        c = f_g * c + i_g * g_g
        h = o_g * jnp.tanh(c)

        # Scatter the two halves to their output time rows (static masked row stores,
        # off the critical path).  Padded lanes of h are exactly zero.
        hbuf_ref[j:j + 1, 0:Hp] = h[:, 0:Hp]                 # forward  hidden @ t = j
        hbuf_ref[S - 1 - j:S - j, Hp:H2] = h[:, Hp:H2]       # backward hidden @ t = S-1-j

    # ---- hidden2tag on [h_fwd | h_bwd] + log_softmax(dim=1) ----
    lstm_out = hbuf_ref[...]                                        # (S, 2*H_pad)
    tag = (jnp.dot(lstm_out, wtag_ref[...], preferred_element_type=jnp.float32)
           + btag_ref[...])                                         # (S, T)
    m = jnp.max(tag, axis=-1, keepdims=True)
    shifted = tag - m
    lse = jnp.log(jnp.sum(jnp.exp(shifted), axis=-1, keepdims=True))
    out_ref[...] = (shifted - lse).astype(out_ref.dtype)


# --------------------------- parameter fusion (host) -------------------------
def _round_up(x, m):
    return ((x + m - 1) // m) * m


def _scatter_gates(src, total_rows, row_off, side, H, Hp):
    """Place (n, 4H) src into a zero (total_rows, 8*Hp) array: gate k goes to columns
    [k*2*Hp + side*Hp, k*2*Hp + side*Hp + H) and rows [row_off, row_off+n)."""
    n = src.shape[0]
    out = jnp.zeros((total_rows, 8 * Hp), jnp.float32)
    for k in range(4):                       # PyTorch gate order [i, f, g, o]
        c0 = k * 2 * Hp + side * Hp
        out = out.at[row_off:row_off + n, c0:c0 + H].set(src[:, k * H:(k + 1) * H])
    return out


def fuse_params(params):
    """One-time repack of PyTorch-layout parameters into the fused kernel layout."""
    emb = params["embedding"].astype(jnp.float32)
    wih_f, whh_f, b_f = params["wih_f"], params["whh_f"], params["b_f"]
    wih_b, whh_b, b_b = params["wih_b"], params["whh_b"], params["b_b"]
    wtag, btag = params["wtag"], params["btag"]

    V = emb.shape[0]
    H = whh_f.shape[0]
    T = wtag.shape[1]
    Hp = _round_up(H, 64)                    # 2*Hp is a multiple of 128 lanes

    # Per-token input projections with the combined bias folded in.  One (V,E)@(E,4H)
    # matmul per direction at fuse time replaces the runtime embedding gather and the
    # in-kernel input-projection matmul.
    proj_f = emb @ wih_f + b_f               # (V, 4H)
    proj_b = emb @ wih_b + b_b               # (V, 4H)

    ptab_f = _scatter_gates(proj_f, V, 0, 0, H, Hp).reshape(V, 1, 8 * Hp)
    ptab_b = _scatter_gates(proj_b, V, 0, 1, H, Hp).reshape(V, 1, 8 * Hp)
    whh2 = (_scatter_gates(whh_f, 2 * Hp, 0, 0, H, Hp)
            + _scatter_gates(whh_b, 2 * Hp, Hp, 1, H, Hp))          # (2Hp, 8Hp)

    wtag_pad = jnp.zeros((2 * Hp, T), jnp.float32)                  # row-padded
    wtag_pad = wtag_pad.at[0:H, :].set(wtag[0:H, :])
    wtag_pad = wtag_pad.at[Hp:Hp + H, :].set(wtag[H:2 * H, :])

    return {"ptab_f": ptab_f, "ptab_b": ptab_b, "whh2": whh2,
            "wtag": wtag_pad, "btag": btag}


# --------------------------------- wrapper -----------------------------------
def lstm_tagger_forward(sentence, fused):
    """sentence: int32 (S,) token ids. Returns (S, tagset_size) log-softmax scores."""
    sentence = sentence.astype(jnp.int32)
    S = sentence.shape[0]
    V, _, H8 = fused["ptab_f"].shape
    H2 = fused["whh2"].shape[0]
    T = fused["wtag"].shape[1]

    # Full-array blocks; index_maps are variadic so they absorb (grid idx, prefetch ref).
    full = lambda shape: pl.BlockSpec(shape, lambda *_: (0,) * len(shape))

    return pl.pallas_call(
        _lstm_tagger_kernel,
        out_shape=jax.ShapeDtypeStruct((S, T), jnp.float32),
        grid_spec=pltpu.PrefetchScalarGridSpec(
            num_scalar_prefetch=1,           # sentence -> SMEM, read per step in-kernel
            grid=(1,),
            in_specs=[
                full((V, 1, H8)),            # ptab_f : per-token fwd gate projections
                full((V, 1, H8)),            # ptab_b : per-token bwd gate projections
                full((H2, H8)),              # whh2   : fused recurrent weight
                full((H2, T)),               # wtag   : row-padded hidden2tag weight
                full((1, T)),                # btag
            ],
            out_specs=full((S, T)),
            scratch_shapes=[pltpu.VMEM((S, H2), jnp.float32)],   # lstm_out rows
        ),
        compiler_params=pltpu.CompilerParams(dimension_semantics=("arbitrary",)),
    )(sentence, fused["ptab_f"], fused["ptab_b"], fused["whh2"],
      fused["wtag"], fused["btag"])


# ---------------- pure-JAX reference (un-fused params, for correctness) -------
def _ref_forward(sentence, params):
    embeds = jnp.take(params["embedding"], sentence, axis=0)
    H = params["whh_f"].shape[0]

    def run_dir(xs, wih, whh, b):
        def step(carry, x):
            h, c = carry
            g = x[None, :] @ wih + h @ whh + b
            i_g = jax.nn.sigmoid(g[:, 0 * H:1 * H])
            f_g = jax.nn.sigmoid(g[:, 1 * H:2 * H])
            g_g = jnp.tanh(g[:, 2 * H:3 * H])
            o_g = jax.nn.sigmoid(g[:, 3 * H:4 * H])
            c = f_g * c + i_g * g_g
            h = o_g * jnp.tanh(c)
            return (h, c), h[0]
        h0 = jnp.zeros((1, H), jnp.float32)
        _, hs = lax.scan(step, (h0, h0), xs)
        return hs

    h_f = run_dir(embeds, params["wih_f"], params["whh_f"], params["b_f"])
    h_b = run_dir(embeds[::-1], params["wih_b"], params["whh_b"], params["b_b"])[::-1]
    lstm_out = jnp.concatenate([h_f, h_b], axis=-1)
    tag_space = lstm_out @ params["wtag"] + params["btag"]
    return jax.nn.log_softmax(tag_space, axis=1)


def init_params(key, vocab_size, embedding_dim, hidden_dim, tagset_size):
    ks = jax.random.split(key, 9)
    s = 1.0 / jnp.sqrt(hidden_dim)
    def u(k, shape):
        return jax.random.uniform(k, shape, jnp.float32, -s, s)
    return {
        "embedding": jax.random.normal(ks[0], (vocab_size, embedding_dim), jnp.float32),
        "wih_f": u(ks[1], (embedding_dim, 4 * hidden_dim)),
        "whh_f": u(ks[2], (hidden_dim, 4 * hidden_dim)),
        "b_f":   u(ks[3], (1, 4 * hidden_dim)),
        "wih_b": u(ks[4], (embedding_dim, 4 * hidden_dim)),
        "whh_b": u(ks[5], (hidden_dim, 4 * hidden_dim)),
        "b_b":   u(ks[6], (1, 4 * hidden_dim)),
        "wtag":  u(ks[7], (2 * hidden_dim, tagset_size)),
        "btag":  u(ks[8], (1, tagset_size)),
    }


if __name__ == "__main__":
    vocab_size, embedding_dim, hidden_dim, tagset_size, seq_len = 20, 32, 32, 8, 8

    key = jax.random.PRNGKey(0)
    pkey, skey = jax.random.split(key)
    params = init_params(pkey, vocab_size, embedding_dim, hidden_dim, tagset_size)
    sentence = jax.random.randint(skey, (seq_len,), 0, vocab_size, dtype=jnp.int32)

    fused = jax.block_until_ready(fuse_params(params))

    out = jax.block_until_ready(lstm_tagger_forward(sentence, fused))

    ref = _ref_forward(sentence, params)
    assert out.shape == (seq_len, tagset_size)
    assert jnp.allclose(out, ref, atol=2e-5, rtol=2e-5), "mismatch vs reference"

    print("KERNEL_OK")
</pallas_src>

<mosaic_0001>
module attributes {stable_mosaic.version = 11 : i64} {
  func.func @_lstm_tagger_kernel(%arg0: i32, %arg1: memref<8xi32, #tpu.memory_space<smem>>, %arg2: memref<20x1x512xf32, #tpu.memory_space<vmem>>, %arg3: memref<20x1x512xf32, #tpu.memory_space<vmem>>, %arg4: memref<128x512xf32, #tpu.memory_space<vmem>>, %arg5: memref<128x8xf32, #tpu.memory_space<vmem>>, %arg6: memref<1x8xf32, #tpu.memory_space<vmem>>, %arg7: memref<8x8xf32, #tpu.memory_space<vmem>>, %arg8: memref<8x128xf32, #tpu.memory_space<vmem>>) attributes {dimension_semantics = [#tpu.dimension_semantics<arbitrary>], iteration_bounds = array<i64: 1>, scalar_prefetch = 1 : i64, scratch_operands = 1 : i64, tpu.core_type = #tpu.core_type<tc>, window_params = [{pipeline_mode = #tpu.pipeline_mode<synchronous>, transform_indices = @transform_0, window_bounds = array<i64: 20, 1, 512>}, {pipeline_mode = #tpu.pipeline_mode<synchronous>, transform_indices = @transform_1, window_bounds = array<i64: 20, 1, 512>}, {pipeline_mode = #tpu.pipeline_mode<synchronous>, transform_indices = @transform_2, window_bounds = array<i64: 128, 512>}, {pipeline_mode = #tpu.pipeline_mode<synchronous>, transform_indices = @transform_3, window_bounds = array<i64: 128, 8>}, {pipeline_mode = #tpu.pipeline_mode<synchronous>, transform_indices = @transform_4, window_bounds = array<i64: 1, 8>}, {pipeline_mode = #tpu.pipeline_mode<synchronous>, transform_indices = @transform_5, window_bounds = array<i64: 8, 8>}]} {
    %c0 = arith.constant 0 : index
    %c0_0 = arith.constant 0 : index
    %0 = vector.load %arg4[%c0, %c0_0] : memref<128x512xf32, #tpu.memory_space<vmem>>, vector<128x512xf32>
    %cst = arith.constant 0.000000e+00 : f32
    %1 = vector.broadcast %cst : f32 to vector<1x128xf32>
    %cst_1 = arith.constant 0.000000e+00 : f32
    %2 = vector.broadcast %cst_1 : f32 to vector<1x128xf32>
    %c0_2 = arith.constant 0 : index
    %3 = memref.load %arg1[%c0_2] : memref<8xi32, #tpu.memory_space<smem>>
    %c7 = arith.constant 7 : index
    %4 = memref.load %arg1[%c7] : memref<8xi32, #tpu.memory_space<smem>>
    %5 = arith.index_cast %3 : i32 to index
    %c0_3 = arith.constant 0 : index
    %c0_4 = arith.constant 0 : index
    %6 = vector.load %arg2[%5, %c0_3, %c0_4] : memref<20x1x512xf32, #tpu.memory_space<vmem>>, vector<1x1x512xf32>
    %7 = vector.shape_cast %6 : vector<1x1x512xf32> to vector<1x512xf32>
    %8 = arith.index_cast %4 : i32 to index
    %c0_5 = arith.constant 0 : index
    %c0_6 = arith.constant 0 : index
    %9 = vector.load %arg3[%8, %c0_5, %c0_6] : memref<20x1x512xf32, #tpu.memory_space<vmem>>, vector<1x1x512xf32>
    %10 = vector.shape_cast %9 : vector<1x1x512xf32> to vector<1x512xf32>
    %11 = arith.addf %7, %10 : vector<1x512xf32>
    %cst_7 = arith.constant dense<0.000000e+00> : vector<1x512xf32>
    %12 = tpu.matmul %1, %0, %cst_7 {dimension_numbers = #tpu.dot_dimension_numbers<[1], [0], [0], [1], [0, 0, 1, 1], [], []>} : vector<1x128xf32>, vector<128x512xf32>, vector<1x512xf32> -> vector<1x512xf32>
    %13 = arith.addf %11, %12 : vector<1x512xf32>
    %14 = vector.extract_strided_slice %13 {offsets = [0, 0], sizes = [1, 128], strides = [1, 1]} : vector<1x512xf32> to vector<1x128xf32>
    %15 = arith.negf %14 : vector<1x128xf32>
    %16 = math.exp %15 : vector<1x128xf32>
    %cst_8 = arith.constant 1.000000e+00 : f32
    %17 = vector.broadcast %cst_8 : f32 to vector<1x128xf32>
    %18 = arith.addf %17, %16 : vector<1x128xf32>
    %19 = arith.divf %17, %18 : vector<1x128xf32>
    %20 = vector.extract_strided_slice %13 {offsets = [0, 128], sizes = [1, 128], strides = [1, 1]} : vector<1x512xf32> to vector<1x128xf32>
    %21 = arith.negf %20 : vector<1x128xf32>
    %22 = math.exp %21 : vector<1x128xf32>
    %cst_9 = arith.constant 1.000000e+00 : f32
    %23 = vector.broadcast %cst_9 : f32 to vector<1x128xf32>
    %24 = arith.addf %23, %22 : vector<1x128xf32>
    %25 = arith.divf %23, %24 : vector<1x128xf32>
    %26 = vector.extract_strided_slice %13 {offsets = [0, 256], sizes = [1, 128], strides = [1, 1]} : vector<1x512xf32> to vector<1x128xf32>
    %27 = math.tanh %26 : vector<1x128xf32>
    %28 = vector.extract_strided_slice %13 {offsets = [0, 384], sizes = [1, 128], strides = [1, 1]} : vector<1x512xf32> to vector<1x128xf32>
    %29 = arith.negf %28 : vector<1x128xf32>
    %30 = math.exp %29 : vector<1x128xf32>
    %cst_10 = arith.constant 1.000000e+00 : f32
    %31 = vector.broadcast %cst_10 : f32 to vector<1x128xf32>
    %32 = arith.addf %31, %30 : vector<1x128xf32>
    %33 = arith.divf %31, %32 : vector<1x128xf32>
    %34 = arith.mulf %25, %2 : vector<1x128xf32>
    %35 = arith.mulf %19, %27 : vector<1x128xf32>
    %36 = arith.addf %34, %35 : vector<1x128xf32>
    %37 = math.tanh %36 : vector<1x128xf32>
    %38 = arith.mulf %33, %37 : vector<1x128xf32>
    %39 = vector.extract_strided_slice %38 {offsets = [0, 0], sizes = [1, 64], strides = [1, 1]} : vector<1x128xf32> to vector<1x64xf32>
    %c0_11 = arith.constant 0 : index
    %c0_12 = arith.constant 0 : index
    %40 = vector.load %arg8[%c0_11, %c0_12] : memref<8x128xf32, #tpu.memory_space<vmem>>, vector<1x64xf32>
    tpu.vector_store %arg8[%c0_11, %c0_12], %39 {strides = array<i32>} : memref<8x128xf32, #tpu.memory_space<vmem>>, vector<1x64xf32>,
    %41 = vector.extract_strided_slice %38 {offsets = [0, 64], sizes = [1, 64], strides = [1, 1]} : vector<1x128xf32> to vector<1x64xf32>
    %c7_13 = arith.constant 7 : index
    %c64 = arith.constant 64 : index
    %42 = vector.load %arg8[%c7_13, %c64] : memref<8x128xf32, #tpu.memory_space<vmem>>, vector<1x64xf32>
    tpu.vector_store %arg8[%c7_13, %c64], %41 {strides = array<i32>} : memref<8x128xf32, #tpu.memory_space<vmem>>, vector<1x64xf32>,
    %c1 = arith.constant 1 : index
    %43 = memref.load %arg1[%c1] : memref<8xi32, #tpu.memory_space<smem>>
    %c6 = arith.constant 6 : index
    %44 = memref.load %arg1[%c6] : memref<8xi32, #tpu.memory_space<smem>>
    %45 = arith.index_cast %43 : i32 to index
    %c0_14 = arith.constant 0 : index
    %c0_15 = arith.constant 0 : index
    %46 = vector.load %arg2[%45, %c0_14, %c0_15] : memref<20x1x512xf32, #tpu.memory_space<vmem>>, vector<1x1x512xf32>
    %47 = vector.shape_cast %46 : vector<1x1x512xf32> to vector<1x512xf32>
    %48 = arith.index_cast %44 : i32 to index
    %c0_16 = arith.constant 0 : index
    %c0_17 = arith.constant 0 : index
    %49 = vector.load %arg3[%48, %c0_16, %c0_17] : memref<20x1x512xf32, #tpu.memory_space<vmem>>, vector<1x1x512xf32>
    %50 = vector.shape_cast %49 : vector<1x1x512xf32> to vector<1x512xf32>
    %51 = arith.addf %47, %50 : vector<1x512xf32>
    %cst_18 = arith.constant dense<0.000000e+00> : vector<1x512xf32>
    %52 = tpu.matmul %38, %0, %cst_18 {dimension_numbers = #tpu.dot_dimension_numbers<[1], [0], [0], [1], [0, 0, 1, 1], [], []>} : vector<1x128xf32>, vector<128x512xf32>, vector<1x512xf32> -> vector<1x512xf32>
    %53 = arith.addf %51, %52 : vector<1x512xf32>
    %54 = vector.extract_strided_slice %53 {offsets = [0, 0], sizes = [1, 128], strides = [1, 1]} : vector<1x512xf32> to vector<1x128xf32>
    %55 = arith.negf %54 : vector<1x128xf32>
    %56 = math.exp %55 : vector<1x128xf32>
    %cst_19 = arith.constant 1.000000e+00 : f32
    %57 = vector.broadcast %cst_19 : f32 to vector<1x128xf32>
    %58 = arith.addf %57, %56 : vector<1x128xf32>
    %59 = arith.divf %57, %58 : vector<1x128xf32>
    %60 = vector.extract_strided_slice %53 {offsets = [0, 128], sizes = [1, 128], strides = [1, 1]} : vector<1x512xf32> to vector<1x128xf32>
    %61 = arith.negf %60 : vector<1x128xf32>
    %62 = math.exp %61 : vector<1x128xf32>
    %cst_20 = arith.constant 1.000000e+00 : f32
    %63 = vector.broadcast %cst_20 : f32 to vector<1x128xf32>
    %64 = arith.addf %63, %62 : vector<1x128xf32>
    %65 = arith.divf %63, %64 : vector<1x128xf32>
    %66 = vector.extract_strided_slice %53 {offsets = [0, 256], sizes = [1, 128], strides = [1, 1]} : vector<1x512xf32> to vector<1x128xf32>
    %67 = math.tanh %66 : vector<1x128xf32>
    %68 = vector.extract_strided_slice %53 {offsets = [0, 384], sizes = [1, 128], strides = [1, 1]} : vector<1x512xf32> to vector<1x128xf32>
    %69 = arith.negf %68 : vector<1x128xf32>
    %70 = math.exp %69 : vector<1x128xf32>
    %cst_21 = arith.constant 1.000000e+00 : f32
    %71 = vector.broadcast %cst_21 : f32 to vector<1x128xf32>
    %72 = arith.addf %71, %70 : vector<1x128xf32>
    %73 = arith.divf %71, %72 : vector<1x128xf32>
    %74 = arith.mulf %65, %36 : vector<1x128xf32>
    %75 = arith.mulf %59, %67 : vector<1x128xf32>
    %76 = arith.addf %74, %75 : vector<1x128xf32>
    %77 = math.tanh %76 : vector<1x128xf32>
    %78 = arith.mulf %73, %77 : vector<1x128xf32>
    %79 = vector.extract_strided_slice %78 {offsets = [0, 0], sizes = [1, 64], strides = [1, 1]} : vector<1x128xf32> to vector<1x64xf32>
    %c1_22 = arith.constant 1 : index
    %c0_23 = arith.constant 0 : index
    %80 = vector.load %arg8[%c1_22, %c0_23] : memref<8x128xf32, #tpu.memory_space<vmem>>, vector<1x64xf32>
    tpu.vector_store %arg8[%c1_22, %c0_23], %79 {strides = array<i32>} : memref<8x128xf32, #tpu.memory_space<vmem>>, vector<1x64xf32>,
    %81 = vector.extract_strided_slice %78 {offsets = [0, 64], sizes = [1, 64], strides = [1, 1]} : vector<1x128xf32> to vector<1x64xf32>
    %c6_24 = arith.constant 6 : index
    %c64_25 = arith.constant 64 : index
    %82 = vector.load %arg8[%c6_24, %c64_25] : memref<8x128xf32, #tpu.memory_space<vmem>>, vector<1x64xf32>
    tpu.vector_store %arg8[%c6_24, %c64_25], %81 {strides = array<i32>} : memref<8x128xf32, #tpu.memory_space<vmem>>, vector<1x64xf32>,
    %c2 = arith.constant 2 : index
    %83 = memref.load %arg1[%c2] : memref<8xi32, #tpu.memory_space<smem>>
    %c5 = arith.constant 5 : index
    %84 = memref.load %arg1[%c5] : memref<8xi32, #tpu.memory_space<smem>>
    %85 = arith.index_cast %83 : i32 to index
    %c0_26 = arith.constant 0 : index
    %c0_27 = arith.constant 0 : index
    %86 = vector.load %arg2[%85, %c0_26, %c0_27] : memref<20x1x512xf32, #tpu.memory_space<vmem>>, vector<1x1x512xf32>
    %87 = vector.shape_cast %86 : vector<1x1x512xf32> to vector<1x512xf32>
    %88 = arith.index_cast %84 : i32 to index
    %c0_28 = arith.constant 0 : index
    %c0_29 = arith.constant 0 : index
    %89 = vector.load %arg3[%88, %c0_28, %c0_29] : memref<20x1x512xf32, #tpu.memory_space<vmem>>, vector<1x1x512xf32>
    %90 = vector.shape_cast %89 : vector<1x1x512xf32> to vector<1x512xf32>
    %91 = arith.addf %87, %90 : vector<1x512xf32>
    %cst_30 = arith.constant dense<0.000000e+00> : vector<1x512xf32>
    %92 = tpu.matmul %78, %0, %cst_30 {dimension_numbers = #tpu.dot_dimension_numbers<[1], [0], [0], [1], [0, 0, 1, 1], [], []>} : vector<1x128xf32>, vector<128x512xf32>, vector<1x512xf32> -> vector<1x512xf32>
    %93 = arith.addf %91, %92 : vector<1x512xf32>
    %94 = vector.extract_strided_slice %93 {offsets = [0, 0], sizes = [1, 128], strides = [1, 1]} : vector<1x512xf32> to vector<1x128xf32>
    %95 = arith.negf %94 : vector<1x128xf32>
    %96 = math.exp %95 : vector<1x128xf32>
    %cst_31 = arith.constant 1.000000e+00 : f32
    %97 = vector.broadcast %cst_31 : f32 to vector<1x128xf32>
    %98 = arith.addf %97, %96 : vector<1x128xf32>
    %99 = arith.divf %97, %98 : vector<1x128xf32>
    %100 = vector.extract_strided_slice %93 {offsets = [0, 128], sizes = [1, 128], strides = [1, 1]} : vector<1x512xf32> to vector<1x128xf32>
    %101 = arith.negf %100 : vector<1x128xf32>
    %102 = math.exp %101 : vector<1x128xf32>
    %cst_32 = arith.constant 1.000000e+00 : f32
    %103 = vector.broadcast %cst_32 : f32 to vector<1x128xf32>
    %104 = arith.addf %103, %102 : vector<1x128xf32>
    %105 = arith.divf %103, %104 : vector<1x128xf32>
    %106 = vector.extract_strided_slice %93 {offsets = [0, 256], sizes = [1, 128], strides = [1, 1]} : vector<1x512xf32> to vector<1x128xf32>
    %107 = math.tanh %106 : vector<1x128xf32>
    %108 = vector.extract_strided_slice %93 {offsets = [0, 384], sizes = [1, 128], strides = [1, 1]} : vector<1x512xf32> to vector<1x128xf32>
    %109 = arith.negf %108 : vector<1x128xf32>
    %110 = math.exp %109 : vector<1x128xf32>
    %cst_33 = arith.constant 1.000000e+00 : f32
    %111 = vector.broadcast %cst_33 : f32 to vector<1x128xf32>
    %112 = arith.addf %111, %110 : vector<1x128xf32>
    %113 = arith.divf %111, %112 : vector<1x128xf32>
    %114 = arith.mulf %105, %76 : vector<1x128xf32>
    %115 = arith.mulf %99, %107 : vector<1x128xf32>
    %116 = arith.addf %114, %115 : vector<1x128xf32>
    %117 = math.tanh %116 : vector<1x128xf32>
    %118 = arith.mulf %113, %117 : vector<1x128xf32>
    %119 = vector.extract_strided_slice %118 {offsets = [0, 0], sizes = [1, 64], strides = [1, 1]} : vector<1x128xf32> to vector<1x64xf32>
    %c2_34 = arith.constant 2 : index
    %c0_35 = arith.constant 0 : index
    %120 = vector.load %arg8[%c2_34, %c0_35] : memref<8x128xf32, #tpu.memory_space<vmem>>, vector<1x64xf32>
    tpu.vector_store %arg8[%c2_34, %c0_35], %119 {strides = array<i32>} : memref<8x128xf32, #tpu.memory_space<vmem>>, vector<1x64xf32>,
    %121 = vector.extract_strided_slice %118 {offsets = [0, 64], sizes = [1, 64], strides = [1, 1]} : vector<1x128xf32> to vector<1x64xf32>
    %c5_36 = arith.constant 5 : index
    %c64_37 = arith.constant 64 : index
    %122 = vector.load %arg8[%c5_36, %c64_37] : memref<8x128xf32, #tpu.memory_space<vmem>>, vector<1x64xf32>
    tpu.vector_store %arg8[%c5_36, %c64_37], %121 {strides = array<i32>} : memref<8x128xf32, #tpu.memory_space<vmem>>, vector<1x64xf32>,
    %c3 = arith.constant 3 : index
    %123 = memref.load %arg1[%c3] : memref<8xi32, #tpu.memory_space<smem>>
    %c4 = arith.constant 4 : index
    %124 = memref.load %arg1[%c4] : memref<8xi32, #tpu.memory_space<smem>>
    %125 = arith.index_cast %123 : i32 to index
    %c0_38 = arith.constant 0 : index
    %c0_39 = arith.constant 0 : index
    %126 = vector.load %arg2[%125, %c0_38, %c0_39] : memref<20x1x512xf32, #tpu.memory_space<vmem>>, vector<1x1x512xf32>
    %127 = vector.shape_cast %126 : vector<1x1x512xf32> to vector<1x512xf32>
    %128 = arith.index_cast %124 : i32 to index
    %c0_40 = arith.constant 0 : index
    %c0_41 = arith.constant 0 : index
    %129 = vector.load %arg3[%128, %c0_40, %c0_41] : memref<20x1x512xf32, #tpu.memory_space<vmem>>, vector<1x1x512xf32>
    %130 = vector.shape_cast %129 : vector<1x1x512xf32> to vector<1x512xf32>
    %131 = arith.addf %127, %130 : vector<1x512xf32>
    %cst_42 = arith.constant dense<0.000000e+00> : vector<1x512xf32>
    %132 = tpu.matmul %118, %0, %cst_42 {dimension_numbers = #tpu.dot_dimension_numbers<[1], [0], [0], [1], [0, 0, 1, 1], [], []>} : vector<1x128xf32>, vector<128x512xf32>, vector<1x512xf32> -> vector<1x512xf32>
    %133 = arith.addf %131, %132 : vector<1x512xf32>
    %134 = vector.extract_strided_slice %133 {offsets = [0, 0], sizes = [1, 128], strides = [1, 1]} : vector<1x512xf32> to vector<1x128xf32>
    %135 = arith.negf %134 : vector<1x128xf32>
    %136 = math.exp %135 : vector<1x128xf32>
    %cst_43 = arith.constant 1.000000e+00 : f32
    %137 = vector.broadcast %cst_43 : f32 to vector<1x128xf32>
    %138 = arith.addf %137, %136 : vector<1x128xf32>
    %139 = arith.divf %137, %138 : vector<1x128xf32>
    %140 = vector.extract_strided_slice %133 {offsets = [0, 128], sizes = [1, 128], strides = [1, 1]} : vector<1x512xf32> to vector<1x128xf32>
    %141 = arith.negf %140 : vector<1x128xf32>
    %142 = math.exp %141 : vector<1x128xf32>
    %cst_44 = arith.constant 1.000000e+00 : f32
    %143 = vector.broadcast %cst_44 : f32 to vector<1x128xf32>
    %144 = arith.addf %143, %142 : vector<1x128xf32>
    %145 = arith.divf %143, %144 : vector<1x128xf32>
    %146 = vector.extract_strided_slice %133 {offsets = [0, 256], sizes = [1, 128], strides = [1, 1]} : vector<1x512xf32> to vector<1x128xf32>
    %147 = math.tanh %146 : vector<1x128xf32>
    %148 = vector.extract_strided_slice %133 {offsets = [0, 384], sizes = [1, 128], strides = [1, 1]} : vector<1x512xf32> to vector<1x128xf32>
    %149 = arith.negf %148 : vector<1x128xf32>
    %150 = math.exp %149 : vector<1x128xf32>
    %cst_45 = arith.constant 1.000000e+00 : f32
    %151 = vector.broadcast %cst_45 : f32 to vector<1x128xf32>
    %152 = arith.addf %151, %150 : vector<1x128xf32>
    %153 = arith.divf %151, %152 : vector<1x128xf32>
    %154 = arith.mulf %145, %116 : vector<1x128xf32>
    %155 = arith.mulf %139, %147 : vector<1x128xf32>
    %156 = arith.addf %154, %155 : vector<1x128xf32>
    %157 = math.tanh %156 : vector<1x128xf32>
    %158 = arith.mulf %153, %157 : vector<1x128xf32>
    %159 = vector.extract_strided_slice %158 {offsets = [0, 0], sizes = [1, 64], strides = [1, 1]} : vector<1x128xf32> to vector<1x64xf32>
    %c3_46 = arith.constant 3 : index
    %c0_47 = arith.constant 0 : index
    %160 = vector.load %arg8[%c3_46, %c0_47] : memref<8x128xf32, #tpu.memory_space<vmem>>, vector<1x64xf32>
    tpu.vector_store %arg8[%c3_46, %c0_47], %159 {strides = array<i32>} : memref<8x128xf32, #tpu.memory_space<vmem>>, vector<1x64xf32>,
    %161 = vector.extract_strided_slice %158 {offsets = [0, 64], sizes = [1, 64], strides = [1, 1]} : vector<1x128xf32> to vector<1x64xf32>
    %c4_48 = arith.constant 4 : index
    %c64_49 = arith.constant 64 : index
    %162 = vector.load %arg8[%c4_48, %c64_49] : memref<8x128xf32, #tpu.memory_space<vmem>>, vector<1x64xf32>
    tpu.vector_store %arg8[%c4_48, %c64_49], %161 {strides = array<i32>} : memref<8x128xf32, #tpu.memory_space<vmem>>, vector<1x64xf32>,
    %c4_50 = arith.constant 4 : index
    %163 = memref.load %arg1[%c4_50] : memref<8xi32, #tpu.memory_space<smem>>
    %c3_51 = arith.constant 3 : index
    %164 = memref.load %arg1[%c3_51] : memref<8xi32, #tpu.memory_space<smem>>
    %165 = arith.index_cast %163 : i32 to index
    %c0_52 = arith.constant 0 : index
    %c0_53 = arith.constant 0 : index
    %166 = vector.load %arg2[%165, %c0_52, %c0_53] : memref<20x1x512xf32, #tpu.memory_space<vmem>>, vector<1x1x512xf32>
    %167 = vector.shape_cast %166 : vector<1x1x512xf32> to vector<1x512xf32>
    %168 = arith.index_cast %164 : i32 to index
    %c0_54 = arith.constant 0 : index
    %c0_55 = arith.constant 0 : index
    %169 = vector.load %arg3[%168, %c0_54, %c0_55] : memref<20x1x512xf32, #tpu.memory_space<vmem>>, vector<1x1x512xf32>
    %170 = vector.shape_cast %169 : vector<1x1x512xf32> to vector<1x512xf32>
    %171 = arith.addf %167, %170 : vector<1x512xf32>
    %cst_56 = arith.constant dense<0.000000e+00> : vector<1x512xf32>
    %172 = tpu.matmul %158, %0, %cst_56 {dimension_numbers = #tpu.dot_dimension_numbers<[1], [0], [0], [1], [0, 0, 1, 1], [], []>} : vector<1x128xf32>, vector<128x512xf32>, vector<1x512xf32> -> vector<1x512xf32>
    %173 = arith.addf %171, %172 : vector<1x512xf32>
    %174 = vector.extract_strided_slice %173 {offsets = [0, 0], sizes = [1, 128], strides = [1, 1]} : vector<1x512xf32> to vector<1x128xf32>
    %175 = arith.negf %174 : vector<1x128xf32>
    %176 = math.exp %175 : vector<1x128xf32>
    %cst_57 = arith.constant 1.000000e+00 : f32
    %177 = vector.broadcast %cst_57 : f32 to vector<1x128xf32>
    %178 = arith.addf %177, %176 : vector<1x128xf32>
    %179 = arith.divf %177, %178 : vector<1x128xf32>
    %180 = vector.extract_strided_slice %173 {offsets = [0, 128], sizes = [1, 128], strides = [1, 1]} : vector<1x512xf32> to vector<1x128xf32>
    %181 = arith.negf %180 : vector<1x128xf32>
    %182 = math.exp %181 : vector<1x128xf32>
    %cst_58 = arith.constant 1.000000e+00 : f32
    %183 = vector.broadcast %cst_58 : f32 to vector<1x128xf32>
    %184 = arith.addf %183, %182 : vector<1x128xf32>
    %185 = arith.divf %183, %184 : vector<1x128xf32>
    %186 = vector.extract_strided_slice %173 {offsets = [0, 256], sizes = [1, 128], strides = [1, 1]} : vector<1x512xf32> to vector<1x128xf32>
    %187 = math.tanh %186 : vector<1x128xf32>
    %188 = vector.extract_strided_slice %173 {offsets = [0, 384], sizes = [1, 128], strides = [1, 1]} : vector<1x512xf32> to vector<1x128xf32>
    %189 = arith.negf %188 : vector<1x128xf32>
    %190 = math.exp %189 : vector<1x128xf32>
    %cst_59 = arith.constant 1.000000e+00 : f32
    %191 = vector.broadcast %cst_59 : f32 to vector<1x128xf32>
    %192 = arith.addf %191, %190 : vector<1x128xf32>
    %193 = arith.divf %191, %192 : vector<1x128xf32>
    %194 = arith.mulf %185, %156 : vector<1x128xf32>
    %195 = arith.mulf %179, %187 : vector<1x128xf32>
    %196 = arith.addf %194, %195 : vector<1x128xf32>
    %197 = math.tanh %196 : vector<1x128xf32>
    %198 = arith.mulf %193, %197 : vector<1x128xf32>
    %199 = vector.extract_strided_slice %198 {offsets = [0, 0], sizes = [1, 64], strides = [1, 1]} : vector<1x128xf32> to vector<1x64xf32>
    %c4_60 = arith.constant 4 : index
    %c0_61 = arith.constant 0 : index
    %200 = vector.load %arg8[%c4_60, %c0_61] : memref<8x128xf32, #tpu.memory_space<vmem>>, vector<1x64xf32>
    tpu.vector_store %arg8[%c4_60, %c0_61], %199 {strides = array<i32>} : memref<8x128xf32, #tpu.memory_space<vmem>>, vector<1x64xf32>,
    %201 = vector.extract_strided_slice %198 {offsets = [0, 64], sizes = [1, 64], strides = [1, 1]} : vector<1x128xf32> to vector<1x64xf32>
    %c3_62 = arith.constant 3 : index
    %c64_63 = arith.constant 64 : index
    %202 = vector.load %arg8[%c3_62, %c64_63] : memref<8x128xf32, #tpu.memory_space<vmem>>, vector<1x64xf32>
    tpu.vector_store %arg8[%c3_62, %c64_63], %201 {strides = array<i32>} : memref<8x128xf32, #tpu.memory_space<vmem>>, vector<1x64xf32>,
    %c5_64 = arith.constant 5 : index
    %203 = memref.load %arg1[%c5_64] : memref<8xi32, #tpu.memory_space<smem>>
    %c2_65 = arith.constant 2 : index
    %204 = memref.load %arg1[%c2_65] : memref<8xi32, #tpu.memory_space<smem>>
    %205 = arith.index_cast %203 : i32 to index
    %c0_66 = arith.constant 0 : index
    %c0_67 = arith.constant 0 : index
    %206 = vector.load %arg2[%205, %c0_66, %c0_67] : memref<20x1x512xf32, #tpu.memory_space<vmem>>, vector<1x1x512xf32>
    %207 = vector.shape_cast %206 : vector<1x1x512xf32> to vector<1x512xf32>
    %208 = arith.index_cast %204 : i32 to index
    %c0_68 = arith.constant 0 : index
    %c0_69 = arith.constant 0 : index
    %209 = vector.load %arg3[%208, %c0_68, %c0_69] : memref<20x1x512xf32, #tpu.memory_space<vmem>>, vector<1x1x512xf32>
    %210 = vector.shape_cast %209 : vector<1x1x512xf32> to vector<1x512xf32>
    %211 = arith.addf %207, %210 : vector<1x512xf32>
    %cst_70 = arith.constant dense<0.000000e+00> : vector<1x512xf32>
    %212 = tpu.matmul %198, %0, %cst_70 {dimension_numbers = #tpu.dot_dimension_numbers<[1], [0], [0], [1], [0, 0, 1, 1], [], []>} : vector<1x128xf32>, vector<128x512xf32>, vector<1x512xf32> -> vector<1x512xf32>
    %213 = arith.addf %211, %212 : vector<1x512xf32>
    %214 = vector.extract_strided_slice %213 {offsets = [0, 0], sizes = [1, 128], strides = [1, 1]} : vector<1x512xf32> to vector<1x128xf32>
    %215 = arith.negf %214 : vector<1x128xf32>
    %216 = math.exp %215 : vector<1x128xf32>
    %cst_71 = arith.constant 1.000000e+00 : f32
    %217 = vector.broadcast %cst_71 : f32 to vector<1x128xf32>
    %218 = arith.addf %217, %216 : vector<1x128xf32>
    %219 = arith.divf %217, %218 : vector<1x128xf32>
    %220 = vector.extract_strided_slice %213 {offsets = [0, 128], sizes = [1, 128], strides = [1, 1]} : vector<1x512xf32> to vector<1x128xf32>
    %221 = arith.negf %220 : vector<1x128xf32>
    %222 = math.exp %221 : vector<1x128xf32>
    %cst_72 = arith.constant 1.000000e+00 : f32
    %223 = vector.broadcast %cst_72 : f32 to vector<1x128xf32>
    %224 = arith.addf %223, %222 : vector<1x128xf32>
    %225 = arith.divf %223, %224 : vector<1x128xf32>
    %226 = vector.extract_strided_slice %213 {offsets = [0, 256], sizes = [1, 128], strides = [1, 1]} : vector<1x512xf32> to vector<1x128xf32>
    %227 = math.tanh %226 : vector<1x128xf32>
    %228 = vector.extract_strided_slice %213 {offsets = [0, 384], sizes = [1, 128], strides = [1, 1]} : vector<1x512xf32> to vector<1x128xf32>
    %229 = arith.negf %228 : vector<1x128xf32>
    %230 = math.exp %229 : vector<1x128xf32>
    %cst_73 = arith.constant 1.000000e+00 : f32
    %231 = vector.broadcast %cst_73 : f32 to vector<1x128xf32>
    %232 = arith.addf %231, %230 : vector<1x128xf32>
    %233 = arith.divf %231, %232 : vector<1x128xf32>
    %234 = arith.mulf %225, %196 : vector<1x128xf32>
    %235 = arith.mulf %219, %227 : vector<1x128xf32>
    %236 = arith.addf %234, %235 : vector<1x128xf32>
    %237 = math.tanh %236 : vector<1x128xf32>
    %238 = arith.mulf %233, %237 : vector<1x128xf32>
    %239 = vector.extract_strided_slice %238 {offsets = [0, 0], sizes = [1, 64], strides = [1, 1]} : vector<1x128xf32> to vector<1x64xf32>
    %c5_74 = arith.constant 5 : index
    %c0_75 = arith.constant 0 : index
    %240 = vector.load %arg8[%c5_74, %c0_75] : memref<8x128xf32, #tpu.memory_space<vmem>>, vector<1x64xf32>
    tpu.vector_store %arg8[%c5_74, %c0_75], %239 {strides = array<i32>} : memref<8x128xf32, #tpu.memory_space<vmem>>, vector<1x64xf32>,
    %241 = vector.extract_strided_slice %238 {offsets = [0, 64], sizes = [1, 64], strides = [1, 1]} : vector<1x128xf32> to vector<1x64xf32>
    %c2_76 = arith.constant 2 : index
    %c64_77 = arith.constant 64 : index
    %242 = vector.load %arg8[%c2_76, %c64_77] : memref<8x128xf32, #tpu.memory_space<vmem>>, vector<1x64xf32>
    tpu.vector_store %arg8[%c2_76, %c64_77], %241 {strides = array<i32>} : memref<8x128xf32, #tpu.memory_space<vmem>>, vector<1x64xf32>,
    %c6_78 = arith.constant 6 : index
    %243 = memref.load %arg1[%c6_78] : memref<8xi32, #tpu.memory_space<smem>>
    %c1_79 = arith.constant 1 : index
    %244 = memref.load %arg1[%c1_79] : memref<8xi32, #tpu.memory_space<smem>>
    %245 = arith.index_cast %243 : i32 to index
    %c0_80 = arith.constant 0 : index
    %c0_81 = arith.constant 0 : index
    %246 = vector.load %arg2[%245, %c0_80, %c0_81] : memref<20x1x512xf32, #tpu.memory_space<vmem>>, vector<1x1x512xf32>
    %247 = vector.shape_cast %246 : vector<1x1x512xf32> to vector<1x512xf32>
    %248 = arith.index_cast %244 : i32 to index
    %c0_82 = arith.constant 0 : index
    %c0_83 = arith.constant 0 : index
    %249 = vector.load %arg3[%248, %c0_82, %c0_83] : memref<20x1x512xf32, #tpu.memory_space<vmem>>, vector<1x1x512xf32>
    %250 = vector.shape_cast %249 : vector<1x1x512xf32> to vector<1x512xf32>
    %251 = arith.addf %247, %250 : vector<1x512xf32>
    %cst_84 = arith.constant dense<0.000000e+00> : vector<1x512xf32>
    %252 = tpu.matmul %238, %0, %cst_84 {dimension_numbers = #tpu.dot_dimension_numbers<[1], [0], [0], [1], [0, 0, 1, 1], [], []>} : vector<1x128xf32>, vector<128x512xf32>, vector<1x512xf32> -> vector<1x512xf32>
    %253 = arith.addf %251, %252 : vector<1x512xf32>
    %254 = vector.extract_strided_slice %253 {offsets = [0, 0], sizes = [1, 128], strides = [1, 1]} : vector<1x512xf32> to vector<1x128xf32>
    %255 = arith.negf %254 : vector<1x128xf32>
    %256 = math.exp %255 : vector<1x128xf32>
    %cst_85 = arith.constant 1.000000e+00 : f32
    %257 = vector.broadcast %cst_85 : f32 to vector<1x128xf32>
    %258 = arith.addf %257, %256 : vector<1x128xf32>
    %259 = arith.divf %257, %258 : vector<1x128xf32>
    %260 = vector.extract_strided_slice %253 {offsets = [0, 128], sizes = [1, 128], strides = [1, 1]} : vector<1x512xf32> to vector<1x128xf32>
    %261 = arith.negf %260 : vector<1x128xf32>
    %262 = math.exp %261 : vector<1x128xf32>
    %cst_86 = arith.constant 1.000000e+00 : f32
    %263 = vector.broadcast %cst_86 : f32 to vector<1x128xf32>
    %264 = arith.addf %263, %262 : vector<1x128xf32>
    %265 = arith.divf %263, %264 : vector<1x128xf32>
    %266 = vector.extract_strided_slice %253 {offsets = [0, 256], sizes = [1, 128], strides = [1, 1]} : vector<1x512xf32> to vector<1x128xf32>
    %267 = math.tanh %266 : vector<1x128xf32>
    %268 = vector.extract_strided_slice %253 {offsets = [0, 384], sizes = [1, 128], strides = [1, 1]} : vector<1x512xf32> to vector<1x128xf32>
    %269 = arith.negf %268 : vector<1x128xf32>
    %270 = math.exp %269 : vector<1x128xf32>
    %cst_87 = arith.constant 1.000000e+00 : f32
    %271 = vector.broadcast %cst_87 : f32 to vector<1x128xf32>
    %272 = arith.addf %271, %270 : vector<1x128xf32>
    %273 = arith.divf %271, %272 : vector<1x128xf32>
    %274 = arith.mulf %265, %236 : vector<1x128xf32>
    %275 = arith.mulf %259, %267 : vector<1x128xf32>
    %276 = arith.addf %274, %275 : vector<1x128xf32>
    %277 = math.tanh %276 : vector<1x128xf32>
    %278 = arith.mulf %273, %277 : vector<1x128xf32>
    %279 = vector.extract_strided_slice %278 {offsets = [0, 0], sizes = [1, 64], strides = [1, 1]} : vector<1x128xf32> to vector<1x64xf32>
    %c6_88 = arith.constant 6 : index
    %c0_89 = arith.constant 0 : index
    %280 = vector.load %arg8[%c6_88, %c0_89] : memref<8x128xf32, #tpu.memory_space<vmem>>, vector<1x64xf32>
    tpu.vector_store %arg8[%c6_88, %c0_89], %279 {strides = array<i32>} : memref<8x128xf32, #tpu.memory_space<vmem>>, vector<1x64xf32>,
    %281 = vector.extract_strided_slice %278 {offsets = [0, 64], sizes = [1, 64], strides = [1, 1]} : vector<1x128xf32> to vector<1x64xf32>
    %c1_90 = arith.constant 1 : index
    %c64_91 = arith.constant 64 : index
    %282 = vector.load %arg8[%c1_90, %c64_91] : memref<8x128xf32, #tpu.memory_space<vmem>>, vector<1x64xf32>
    tpu.vector_store %arg8[%c1_90, %c64_91], %281 {strides = array<i32>} : memref<8x128xf32, #tpu.memory_space<vmem>>, vector<1x64xf32>,
    %c7_92 = arith.constant 7 : index
    %283 = memref.load %arg1[%c7_92] : memref<8xi32, #tpu.memory_space<smem>>
    %c0_93 = arith.constant 0 : index
    %284 = memref.load %arg1[%c0_93] : memref<8xi32, #tpu.memory_space<smem>>
    %285 = arith.index_cast %283 : i32 to index
    %c0_94 = arith.constant 0 : index
    %c0_95 = arith.constant 0 : index
    %286 = vector.load %arg2[%285, %c0_94, %c0_95] : memref<20x1x512xf32, #tpu.memory_space<vmem>>, vector<1x1x512xf32>
    %287 = vector.shape_cast %286 : vector<1x1x512xf32> to vector<1x512xf32>
    %288 = arith.index_cast %284 : i32 to index
    %c0_96 = arith.constant 0 : index
    %c0_97 = arith.constant 0 : index
    %289 = vector.load %arg3[%288, %c0_96, %c0_97] : memref<20x1x512xf32, #tpu.memory_space<vmem>>, vector<1x1x512xf32>
    %290 = vector.shape_cast %289 : vector<1x1x512xf32> to vector<1x512xf32>
    %291 = arith.addf %287, %290 : vector<1x512xf32>
    %cst_98 = arith.constant dense<0.000000e+00> : vector<1x512xf32>
    %292 = tpu.matmul %278, %0, %cst_98 {dimension_numbers = #tpu.dot_dimension_numbers<[1], [0], [0], [1], [0, 0, 1, 1], [], []>} : vector<1x128xf32>, vector<128x512xf32>, vector<1x512xf32> -> vector<1x512xf32>
    %293 = arith.addf %291, %292 : vector<1x512xf32>
    %294 = vector.extract_strided_slice %293 {offsets = [0, 0], sizes = [1, 128], strides = [1, 1]} : vector<1x512xf32> to vector<1x128xf32>
    %295 = arith.negf %294 : vector<1x128xf32>
    %296 = math.exp %295 : vector<1x128xf32>
    %cst_99 = arith.constant 1.000000e+00 : f32
    %297 = vector.broadcast %cst_99 : f32 to vector<1x128xf32>
    %298 = arith.addf %297, %296 : vector<1x128xf32>
    %299 = arith.divf %297, %298 : vector<1x128xf32>
    %300 = vector.extract_strided_slice %293 {offsets = [0, 128], sizes = [1, 128], strides = [1, 1]} : vector<1x512xf32> to vector<1x128xf32>
    %301 = arith.negf %300 : vector<1x128xf32>
    %302 = math.exp %301 : vector<1x128xf32>
    %cst_100 = arith.constant 1.000000e+00 : f32
    %303 = vector.broadcast %cst_100 : f32 to vector<1x128xf32>
    %304 = arith.addf %303, %302 : vector<1x128xf32>
    %305 = arith.divf %303, %304 : vector<1x128xf32>
    %306 = vector.extract_strided_slice %293 {offsets = [0, 256], sizes = [1, 128], strides = [1, 1]} : vector<1x512xf32> to vector<1x128xf32>
    %307 = math.tanh %306 : vector<1x128xf32>
    %308 = vector.extract_strided_slice %293 {offsets = [0, 384], sizes = [1, 128], strides = [1, 1]} : vector<1x512xf32> to vector<1x128xf32>
    %309 = arith.negf %308 : vector<1x128xf32>
    %310 = math.exp %309 : vector<1x128xf32>
    %cst_101 = arith.constant 1.000000e+00 : f32
    %311 = vector.broadcast %cst_101 : f32 to vector<1x128xf32>
    %312 = arith.addf %311, %310 : vector<1x128xf32>
    %313 = arith.divf %311, %312 : vector<1x128xf32>
    %314 = arith.mulf %305, %276 : vector<1x128xf32>
    %315 = arith.mulf %299, %307 : vector<1x128xf32>
    %316 = arith.addf %314, %315 : vector<1x128xf32>
    %317 = math.tanh %316 : vector<1x128xf32>
    %318 = arith.mulf %313, %317 : vector<1x128xf32>
    %319 = vector.extract_strided_slice %318 {offsets = [0, 0], sizes = [1, 64], strides = [1, 1]} : vector<1x128xf32> to vector<1x64xf32>
    %c7_102 = arith.constant 7 : index
    %c0_103 = arith.constant 0 : index
    %320 = vector.load %arg8[%c7_102, %c0_103] : memref<8x128xf32, #tpu.memory_space<vmem>>, vector<1x64xf32>
    tpu.vector_store %arg8[%c7_102, %c0_103], %319 {strides = array<i32>} : memref<8x128xf32, #tpu.memory_space<vmem>>, vector<1x64xf32>,
    %321 = vector.extract_strided_slice %318 {offsets = [0, 64], sizes = [1, 64], strides = [1, 1]} : vector<1x128xf32> to vector<1x64xf32>
    %c0_104 = arith.constant 0 : index
    %c64_105 = arith.constant 64 : index
    %322 = vector.load %arg8[%c0_104, %c64_105] : memref<8x128xf32, #tpu.memory_space<vmem>>, vector<1x64xf32>
    tpu.vector_store %arg8[%c0_104, %c64_105], %321 {strides = array<i32>} : memref<8x128xf32, #tpu.memory_space<vmem>>, vector<1x64xf32>,
    %c0_106 = arith.constant 0 : index
    %c0_107 = arith.constant 0 : index
    %323 = vector.load %arg8[%c0_106, %c0_107] : memref<8x128xf32, #tpu.memory_space<vmem>>, vector<8x128xf32>
    %c0_108 = arith.constant 0 : index
    %c0_109 = arith.constant 0 : index
    %324 = vector.load %arg5[%c0_108, %c0_109] : memref<128x8xf32, #tpu.memory_space<vmem>>, vector<128x8xf32>
    %cst_110 = arith.constant dense<0.000000e+00> : vector<8x8xf32>
    %325 = tpu.matmul %323, %324, %cst_110 {dimension_numbers = #tpu.dot_dimension_numbers<[1], [0], [0], [1], [0, 0, 1, 1], [], []>} : vector<8x128xf32>, vector<128x8xf32>, vector<8x8xf32> -> vector<8x8xf32>
    %c0_111 = arith.constant 0 : index
    %c0_112 = arith.constant 0 : index
    %326 = vector.load %arg6[%c0_111, %c0_112] : memref<1x8xf32, #tpu.memory_space<vmem>>, vector<1x8xf32>
    %327 = vector.broadcast %326 : vector<1x8xf32> to vector<8x8xf32>
    %328 = arith.addf %325, %327 : vector<8x8xf32>
    %cst_113 = arith.constant dense<0xFF800000> : vector<8xf32>
    %329 = vector.multi_reduction <maximumf>, %328, %cst_113 [1] : vector<8x8xf32> to vector<8xf32>
    %330 = vector.shape_cast %329 : vector<8xf32> to vector<8x1xf32>
    %331 = vector.broadcast %330 : vector<8x1xf32> to vector<8x8xf32>
    %332 = arith.subf %328, %331 : vector<8x8xf32>
    %333 = math.exp %332 : vector<8x8xf32>
    %cst_114 = arith.constant dense<0.000000e+00> : vector<8xf32>
    %334 = vector.multi_reduction <add>, %333, %cst_114 [1] : vector<8x8xf32> to vector<8xf32>
    %335 = vector.shape_cast %334 : vector<8xf32> to vector<8x1xf32>
    %336 = math.log %335 : vector<8x1xf32>
    %337 = vector.broadcast %336 : vector<8x1xf32> to vector<8x8xf32>
    %338 = arith.subf %332, %337 : vector<8x8xf32>
    %c0_115 = arith.constant 0 : index
    %c0_116 = arith.constant 0 : index
    %339 = vector.load %arg7[%c0_115, %c0_116] : memref<8x8xf32, #tpu.memory_space<vmem>>, vector<8x8xf32>
    tpu.vector_store %arg7[%c0_115, %c0_116], %338 {strides = array<i32>} : memref<8x8xf32, #tpu.memory_space<vmem>>, vector<8x8xf32>,
    return
  }
  func.func @transform_0(%arg0: i32, %arg1: memref<8xi32, #tpu.memory_space<smem>>) -> (i32, i32, i32) {
    %c0_i32 = arith.constant 0 : i32
    %c0_i32_0 = arith.constant 0 : i32
    %c0_i32_1 = arith.constant 0 : i32
    %c0_i32_2 = arith.constant 0 : i32
    return %c0_i32, %c0_i32_0, %c0_i32_1 : i32, i32, i32
  }
  func.func @transform_1(%arg0: i32, %arg1: memref<8xi32, #tpu.memory_space<smem>>) -> (i32, i32, i32) {
    %c0_i32 = arith.constant 0 : i32
    %c0_i32_0 = arith.constant 0 : i32
    %c0_i32_1 = arith.constant 0 : i32
    %c0_i32_2 = arith.constant 0 : i32
    return %c0_i32, %c0_i32_0, %c0_i32_1 : i32, i32, i32
  }
  func.func @transform_2(%arg0: i32, %arg1: memref<8xi32, #tpu.memory_space<smem>>) -> (i32, i32) {
    %c0_i32 = arith.constant 0 : i32
    %c0_i32_0 = arith.constant 0 : i32
    %c0_i32_1 = arith.constant 0 : i32
    return %c0_i32, %c0_i32_0 : i32, i32
  }
  func.func @transform_3(%arg0: i32, %arg1: memref<8xi32, #tpu.memory_space<smem>>) -> (i32, i32) {
    %c0_i32 = arith.constant 0 : i32
    %c0_i32_0 = arith.constant 0 : i32
    %c0_i32_1 = arith.constant 0 : i32
    return %c0_i32, %c0_i32_0 : i32, i32
  }
  func.func @transform_4(%arg0: i32, %arg1: memref<8xi32, #tpu.memory_space<smem>>) -> (i32, i32) {
    %c0_i32 = arith.constant 0 : i32
    %c0_i32_0 = arith.constant 0 : i32
    %c0_i32_1 = arith.constant 0 : i32
    return %c0_i32, %c0_i32_0 : i32, i32
  }
  func.func @transform_5(%arg0: i32, %arg1: memref<8xi32, #tpu.memory_space<smem>>) -> (i32, i32) {
    %c0_i32 = arith.constant 0 : i32
    %c0_i32_0 = arith.constant 0 : i32
    %c0_i32_1 = arith.constant 0 : i32
    return %c0_i32, %c0_i32_0 : i32, i32
  }
}

</mosaic_0001>

<bundles_post_ra>
// kernel: tpu_custom_call.1
= control target key start
LH: loop header
LB: loop body
LE: loop exit
PB: predicated region body
PF: predicated region fallthrough
CT: control target
= control target key end

     0   :  { %s3478_s0 = inlined_call_operand.vmem [shape: s32[8], index: 0, kind: input, shape index: {}]   ;;  %s3479_s1 = inlined_call_operand.vmem [shape: f32[20,1,512], index: 1, kind: input, shape index: {}]   ;;  %s3480_s2 = inlined_call_operand.hbm [shape: f32[20,1,512], index: 2, kind: input, shape index: {}]   ;;  %s3481_s3 = inlined_call_operand.hbm [shape: f32[128,512], index: 3, kind: input, shape index: {}]   ;;  %s3482_s4 = inlined_call_operand.vmem [shape: f32[128,8], index: 4, kind: input, shape index: {}]   ;;  %s3483_s5 = inlined_call_operand.vmem [shape: f32[1,8], index: 5, kind: input, shape index: {}]   ;;  %s3484_s6 = inlined_call_operand.hbm [shape: f32[8,8], index: 6, kind: output, shape index: {}]  }
   0x1   :  { %s11_s23 = sshll.u32 %s3478_s0, 4  ;;  %s12_s23 = int_to_ptr.vmem [resolvable:$true] %s11_s23 }
   0x2   :  { %s2777_s24 = scalar_lea.vmem %s12_s23, 16  ;;  %p2782_p1 = scmp.lt.s32.totalorder %s12_s23, %s12_s23 }
   0x3   :  { %p2778_p0 = scmp.ne.s32.totalorder %s12_s23, %s2777_s24  ;;  %p2783_p2 = scmp.lt.s32.totalorder %s2777_s24, %s2777_s24 }
   0x5   :  { %p2784_p3 = por %p2783_p2, %p2782_p1 }
   0x7   :  { %p2785_p4 = pnand %p2784_p3, %p2778_p0 }
   0x9   :  { %2788 = shalt.err (!%p2785_p4)  }
   0xa   :  { %s2863_s25 = smov [#allocation4]  }
   0xb   :  { %14 = dma.vmem_to_smem %s12_s23, 16, %s2863_s25, [#allocation3] }
   0xc   :  { %2855 = dma.done.wait [#allocation3], 16 }
   0xd   :  { %2856 = vsyncadd [#allocation3], 4294967280 }
   0xe   :  { %16 = sfence }
   0xf   :  { %17 = vsyncpa [#allocation6], 0 }
  0x10   :  { %18 = vsyncpa [#allocation9], 0 }
  0x11   :  { %19 = vsyncpa [#allocation7], 0  ;;  %s2864_s26 = smov [#allocation5]   ;;  %s2789_s29 = scalar_lea.hbm %s3480_s2, 1280 }
  0x12   :  { %s27_s27 = sshll.u32 %s2864_s26, 4  ;;  %p2790_p5 = scmp.ne.s32.totalorder %s3480_s2, %s2789_s29  ;;  %s28_s27 = int_to_ptr.vmem [resolvable:$true] %s27_s27 }
  0x13   :  { %p2793_p6 = scmp.lt.u32.totalorder %s2789_s29, %s3480_s2 }
  0x15   :  { %p2795_p7 = pnand %p2793_p6, %p2790_p5 }
  0x17   :  { %2798 = shalt.err (!%p2795_p7)
}
  0x18   :  { %s2799_s10 = scalar_lea.vmem %s28_s27, 1280  ;;  %p2804_p9 = scmp.lt.s32.totalorder %s28_s27, %s28_s27 }
  0x19   :  { %p2800_p8 = scmp.ne.s32.totalorder %s28_s27, %s2799_s10  ;;  %p2805_p10 = scmp.lt.s32.totalorder %s2799_s10, %s2799_s10 }
  0x1b   :  { %p2806_p11 = por %p2805_p10, %p2804_p9 }
  0x1d   :  { %p2807_p12 = pnand %p2806_p11, %p2800_p8 }
  0x1f   :  { %2810 = shalt.err (!%p2807_p12)
}
  0x20   :  { %s2865_s11 = smov 64   ;;  %s2866_s12 = smov 4  }
  0x21   :  { %33 = dma.hbm_to_vmem [thread:$0]  %s3480_s2, 1280, %s28_s27, [#allocation6], %s2865_s11, %s2865_s11, %s2866_s12  }
  0x22   :  { %s2867_s15 = smov [#allocation8]   ;;  %s2811_s19 = scalar_lea.hbm %s3481_s3, 8192 }
  0x23   :  { %s39_s16 = sshll.u32 %s2867_s15, 4  ;;  %p2812_p13 = scmp.ne.s32.totalorder %s3481_s3, %s2811_s19  ;;  %s40_s16 = int_to_ptr.vmem [resolvable:$true] %s39_s16 }
  0x24   :  { %p2815_p0 = scmp.lt.u32.totalorder %s2811_s19, %s3481_s3 }
  0x26   :  { %p2817_p1 = pnand %p2815_p0, %p2812_p13 }
  0x28   :  { %2820 = shalt.err (!%p2817_p1)
}
  0x29   :  { %s2821_s24 = scalar_lea.vmem %s40_s16, 8192  ;;  %p2826_p3 = scmp.lt.s32.totalorder %s40_s16, %s40_s16 }
  0x2a   :  { %p2822_p2 = scmp.ne.s32.totalorder %s40_s16, %s2821_s24  ;;  %p2827_p4 = scmp.lt.s32.totalorder %s2821_s24, %s2821_s24 }
  0x2c   :  { %p2828_p5 = por %p2827_p4, %p2826_p3 }
  0x2e   :  { %p2829_p6 = pnand %p2828_p5, %p2822_p2 }
  0x30   :  { %2832 = shalt.err (!%p2829_p6)
}
  0x31   :  { %s2868_s2 = smov 512   ;;  %s2869_s25 = smov 32  }
  0x32   :  { %45 = dma.hbm_to_vmem [thread:$0]  %s3481_s3, 8192, %s40_s16, [#allocation9], %s2868_s2, %s2868_s2, %s2869_s25  }
  0x33   :  { %2857 = dma.done.wait [#allocation6], 1280  }
  0x34   :  { %2858 = vsyncadd [#allocation6], 4294966016 }
  0x35   :  { %2859 = dma.done.wait [#allocation9], 8192  }
  0x36   :  { %2860 = vsyncadd [#allocation9], 4294959104  ;;  %v2870_v0 = vmov 0.0   ;;  %v57_v1 = vld [vmem:[#allocation8 + $0x8] sm:$0xff]  ;;  %v59_v3 = vld [vmem:[#allocation8 + $0x18] sm:$0xff]  ;;  %s120_s3 = sld [smem:[#allocation4]] }
  0x37   :  { %193 = vmatprep.mubr.f32.mxu0 %v2870_v0  ;;  %264 = vmatprep.mubr.f32.mxu1 %v2870_v0  ;;  %v61_v2 = vld [vmem:[#allocation8 + $0x28] sm:$0xff]  ;;  %v63_v5 = vld [vmem:[#allocation8 + $0x38] sm:$0xff]  ;;  %v56_v6 = vld [vmem:[#allocation8] sm:$0xff]  ;;  %s1990_s0 = sld [smem:[#allocation4 + $0x7]]  ;;  %vm332_vm0 = vcmask 516096   ;;  %vm334_vm1 = vcmask 1040896  }
  0x38   :  { %v2939_v4 = vpack.c.bf16 %v61_v2, %v57_v1  ;;  %v60_v7 = vld [vmem:[#allocation8 + $0x20] sm:$0xff]  ;;  %v2941_v8 = vpack.c.bf16 %v63_v5, %v59_v3  ;;  %v58_v10 = vld [vmem:[#allocation8 + $0x10] sm:$0xff]  ;;  %v65_v12 = vld [vmem:[#allocation8 + $0x48] sm:$0xff]  ;;  %s3120_s10 = sld [smem:[#allocation4 + $0x1]]  ;;  %s3122_s11 = sld [smem:[#allocation4 + $0x6]]  ;;  %vm2873_vm2 = vmmov 0  }
  0x39   :  { %v2943_v9 = vpack.c.bf16 %v60_v7, %v56_v6  ;;  %v62_v11 = vld [vmem:[#allocation8 + $0x30] sm:$0xff]  ;;  %v69_v14 = vld [vmem:[#allocation8 + $0x68] sm:$0xff]  ;;  %v67_v15 = vld [vmem:[#allocation8 + $0x58] sm:$0xff]  ;;  %s3176_s18 = sld [smem:[#allocation4 + $0x2]]  ;;  %s3178_s19 = sld [smem:[#allocation4 + $0x5]]  ;;  %vm1928_vm3 = vcmask 64512  }
  0x3a   :  { %2098 = vmatprep.subr.bf16.mxu0 %v2939_v4  ;;  %v2946_v13 = vpack.c.bf16 %v62_v11, %v58_v10  ;;  %v71_v16 = vld [vmem:[#allocation8 + $0x78] sm:$0xff]  ;;  %2130 = vmatprep.subr.bf16.mxu1 %v2941_v8  ;;  %v2950_v17 = vpack.c.bf16 %v69_v14, %v65_v12  ;;  %v64_v19 = vld [vmem:[#allocation8 + $0x40] sm:$0xff]  ;;  %v66_v21 = vld [vmem:[#allocation8 + $0x50] sm:$0xff]  ;;  %s3232_s25 = sld [smem:[#allocation4 + $0x3]]  ;;  %s3234_s26 = sld [smem:[#allocation4 + $0x4]] }
  0x3b   :  { %2100 = vmatpush1.bf16.msra.mxu0 %v2943_v9  ;;  %v2952_v18 = vpack.c.bf16 %v71_v16, %v67_v15  ;;  %v68_v20 = vld [vmem:[#allocation8 + $0x60] sm:$0xff]  ;;  %v70_v23 = vld [vmem:[#allocation8 + $0x70] sm:$0xff]  ;;  %v73_v24 = vld [vmem:[#allocation8 + $0x88] sm:$0xff] }
  0x3c   :  { %2132 = vmatpush1.bf16.msra.mxu1 %v2946_v13  ;;  %v2955_v22 = vpack.c.bf16 %v68_v20, %v64_v19  ;;  %v77_v25 = vld [vmem:[#allocation8 + $0xa8] sm:$0xff]  ;;  %2102 = vmatprep.subr.bf16.mxu0 %v2950_v17  ;;  %v2959_v26 = vpack.c.bf16 %v70_v23, %v66_v21  ;;  %v75_v28 = vld [vmem:[#allocation8 + $0x98] sm:$0xff]  ;;  %v72_v30 = vld [vmem:[#allocation8 + $0x80] sm:$0xff]  ;;  %s1991_s28 = sshll.u32 %s120_s3, 2 }
  0x3d   :  { %2134 = vmatprep.subr.bf16.mxu1 %v2952_v18  ;;  %v2961_v27 = vpack.c.bf16 %v77_v25, %v73_v24  ;;  %v79_v29 = vld [vmem:[#allocation8 + $0xb8] sm:$0xff]  ;;  %v76_v32 = vld [vmem:[#allocation8 + $0xa0] sm:$0xff]  ;;  %v74_v33 = vld [vmem:[#allocation8 + $0x90] sm:$0xff]  ;;  %s1992_s29 = sshll.u32 %s1990_s0, 2  ;;  %s123_s8 = scalar_lea.vmem %s3479_s1, %s1991_s28 }
  0x3e   :  { %v2963_v31 = vpack.c.bf16 %v79_v29, %v75_v28  ;;  %v78_v34 = vld [vmem:[#allocation8 + $0xb0] sm:$0xff]  ;;  %v2966_v35 = vpack.c.bf16 %v76_v32, %v72_v30  ;;  %v81_v36 = vld [vmem:[#allocation8 + $0xc8] sm:$0xff]  ;;  %v83_v38 = vld [vmem:[#allocation8 + $0xd8] sm:$0xff]  ;;  %s126_s9 = scalar_lea.vmem [#allocation5], %s1992_s29  ;;  %s1998_s12 = sshll.u32 %s3120_s10, 2 }
  0x3f   :  { %2104 = vmatpush1.bf16.msra.mxu0 %v2955_v22  ;;  %v85_v37 = vld [vmem:[#allocation8 + $0xe8] sm:$0xff]  ;;  %v2970_v39 = vpack.c.bf16 %v78_v34, %v74_v33  ;;  %v87_v41 = vld [vmem:[#allocation8 + $0xf8] sm:$0xff]  ;;  %v80_v42 = vld [vmem:[#allocation8 + $0xc0] sm:$0xff]  ;;  %s1999_s13 = sshll.u32 %s3122_s11, 2  ;;  %s339_s16 = scalar_lea.vmem %s3479_s1, %s1998_s12 }
  0x40   :  { %2136 = vmatpush1.bf16.msra.mxu1 %v2959_v26  ;;  %2106 = vmatprep.subr.bf16.mxu0 %v2961_v27  ;;  %v2972_v40 = vpack.c.bf16 %v85_v37, %v81_v36  ;;  %v84_v43 = vld [vmem:[#allocation8 + $0xe0] sm:$0xff]  ;;  %v2975_v44 = vpack.c.bf16 %v87_v41, %v83_v38  ;;  %v82_v45 = vld [vmem:[#allocation8 + $0xd0] sm:$0xff]  ;;  %v89_v47 = vld [vmem:[#allocation8 + $0x108] sm:$0xff]  ;;  %s342_s17 = scalar_lea.vmem [#allocation5], %s1999_s13  ;;  %s2005_s20 = sshll.u32 %s3176_s18, 2 }
  0x41   :  { %2138 = vmatprep.subr.bf16.mxu1 %v2963_v31  ;;  %v86_v46 = vld [vmem:[#allocation8 + $0xf0] sm:$0xff]  ;;  %v93_v48 = vld [vmem:[#allocation8 + $0x128] sm:$0xff]  ;;  %v91_v49 = vld [vmem:[#allocation8 + $0x118] sm:$0xff]  ;;  %v2978_v51 = vpack.c.bf16 %v84_v43, %v80_v42  ;;  %s2006_s21 = sshll.u32 %s3178_s19, 2  ;;  %s553_s24 = scalar_lea.vmem %s3479_s1, %s2005_s20 }
  0x42   :  { %v95_v50 = vld [vmem:[#allocation8 + $0x138] sm:$0xff]  ;;  %v2982_v52 = vpack.c.bf16 %v86_v46, %v82_v45  ;;  %v2984_v53 = vpack.c.bf16 %v93_v48, %v89_v47  ;;  %v88_v54 = vld [vmem:[#allocation8 + $0x100] sm:$0xff]  ;;  %v90_v56 = vld [vmem:[#allocation8 + $0x110] sm:$0xff]  ;;  %v2871_v48 = vmov 1966171168   ;;  %s556_s2 = scalar_lea.vmem [#allocation5], %s2006_s21 }
  0x43   :  { %2108 = vmatpush1.bf16.msra.mxu0 %v2966_v35  ;;  %v92_v55 = vld [vmem:[#allocation8 + $0x120] sm:$0xff]  ;;  %v2987_v57 = vpack.c.bf16 %v95_v50, %v91_v49  ;;  %v94_v58 = vld [vmem:[#allocation8 + $0x130] sm:$0xff]  ;;  %v97_v59 = vld [vmem:[#allocation8 + $0x148] sm:$0xff]  ;;  %v278_v49 = vunpack.c.l.s4 %v2871_v48  ;;  %v280_v50 = vlaneseq  ;;  %s2012_s27 = sshll.u32 %s3232_s25, 2  ;;  %s2013_s3 = sshll.u32 %s3234_s26, 2 }
  0x44   :  { %2140 = vmatpush1.bf16.msra.mxu1 %v2970_v39  ;;  %2110 = vmatprep.subr.bf16.mxu0 %v2972_v40  ;;  %v101_v60 = vld [vmem:[#allocation8 + $0x168] sm:$0xff]  ;;  %v99_v61 = vld [vmem:[#allocation8 + $0x158] sm:$0xff]  ;;  %v2990_v63 = vpack.c.bf16 %v92_v55, %v88_v54  ;;  %v2994_v1 = vpack.c.bf16 %v94_v58, %v90_v56  ;;  %v96_v3 = vld [vmem:[#allocation8 + $0x140] sm:$0xff]  ;;  %s767_s29 = scalar_lea.vmem %s3479_s1, %s2012_s27  ;;  %s770_s30 = scalar_lea.vmem [#allocation5], %s2013_s3 }
  0x45   :  { %2142 = vmatprep.subr.bf16.mxu1 %v2975_v44  ;;  %v103_v62 = vld [vmem:[#allocation8 + $0x178] sm:$0xff]  ;;  %v2996_v2 = vpack.c.bf16 %v101_v60, %v97_v59  ;;  %v100_v5 = vld [vmem:[#allocation8 + $0x160] sm:$0xff]  ;;  %v98_v6 = vld [vmem:[#allocation8 + $0x150] sm:$0xff]  ;;  %v279_v54 = vunpack.c.0.s8 %v278_v49  ;;  %v281_v55 = vshrl.u32 %v280_v50, 7  ;;  %s984_s14 = scalar_lea.vmem [#allocation5], %s2012_s27  ;;  %s1198_s22 = scalar_lea.vmem [#allocation5], %s2005_s20 }
  0x46   :  { %v2999_v7 = vpack.c.bf16 %v103_v62, %v99_v61  ;;  %v102_v10 = vld [vmem:[#allocation8 + $0x170] sm:$0xff]  ;;  %v105_v11 = vld [vmem:[#allocation8 + $0x188] sm:$0xff]  ;;  %v107_v14 = vld [vmem:[#allocation8 + $0x198] sm:$0xff]  ;;  %v3002_v16 = vpack.c.bf16 %v100_v5, %v96_v3  ;;  %s1409_s20 = scalar_lea.vmem %s3479_s1, %s1999_s13 }
  0x47   :  { %2112 = vmatpush1.bf16.msra.mxu0 %v2978_v51  ;;  %v109_v12 = vld [vmem:[#allocation8 + $0x1a8] sm:$0xff]  ;;  %v111_v15 = vld [vmem:[#allocation8 + $0x1b8] sm:$0xff]  ;;  %v3006_v19 = vpack.c.bf16 %v102_v10, %v98_v6  ;;  %v104_v21 = vld [vmem:[#allocation8 + $0x180] sm:$0xff]  ;;  %v3073_v58 = vsub.s32 %v279_v54, %v281_v55 }
  0x48   :  { %2144 = vmatpush1.bf16.msra.mxu1 %v2982_v52  ;;  %2114 = vmatprep.subr.bf16.mxu0 %v2984_v53  ;;  %v3008_v20 = vpack.c.bf16 %v109_v12, %v105_v11  ;;  %v108_v23 = vld [vmem:[#allocation8 + $0x1a0] sm:$0xff]  ;;  %v106_v24 = vld [vmem:[#allocation8 + $0x190] sm:$0xff]  ;;  %v3011_v25 = vpack.c.bf16 %v111_v15, %v107_v14  ;;  %v113_v29 = vld [vmem:[#allocation8 + $0x1c8] sm:$0xff] }
  0x49   :  { %2146 = vmatprep.subr.bf16.mxu1 %v2987_v57  ;;  %v110_v28 = vld [vmem:[#allocation8 + $0x1b0] sm:$0xff]  ;;  %v117_v30 = vld [vmem:[#allocation8 + $0x1e8] sm:$0xff]  ;;  %v115_v32 = vld [vmem:[#allocation8 + $0x1d8] sm:$0xff]  ;;  %v3014_v34 = vpack.c.bf16 %v108_v23, %v104_v21 }
  0x4a   :  { %v119_v33 = vld [vmem:[#allocation8 + $0x1f8] sm:$0xff]  ;;  %v3018_v36 = vpack.c.bf16 %v110_v28, %v106_v24  ;;  %v3020_v37 = vpack.c.bf16 %v117_v30, %v113_v29  ;;  %v112_v38 = vld [vmem:[#allocation8 + $0x1c0] sm:$0xff]  ;;  %v114_v43 = vld [vmem:[#allocation8 + $0x1d0] sm:$0xff] }
  0x4b   :  { %2116 = vmatpush1.bf16.msra.mxu0 %v2990_v63  ;;  %v116_v41 = vld [vmem:[#allocation8 + $0x1e0] sm:$0xff]  ;;  %v3023_v42 = vpack.c.bf16 %v119_v33, %v115_v32  ;;  %v118_v45 = vld [vmem:[#allocation8 + $0x1f0] sm:$0xff]  ;;  %v124_v6 = vld [vmem:[%s123_s8] sm:$0xf] }
  0x4c   :  { %2148 = vmatpush1.bf16.msra.mxu1 %v2994_v1  ;;  %2118 = vmatprep.subr.bf16.mxu0 %v2996_v2  ;;  %v3026_v46 = vpack.c.bf16 %v116_v41, %v112_v38  ;;  %v3030_v47 = vpack.c.bf16 %v118_v45, %v114_v43  ;;  %v127_v10 = vld [vmem:[%s126_s9] sm:$0xf]  ;;  %s981_s9 = scalar_lea.vmem %s3479_s1, %s2013_s3 }
  0x4d   :  { %2150 = vmatprep.subr.bf16.mxu1 %v2999_v7  ;;  %v128_v12 = vadd.f32 %v127_v10, %v124_v6 }
  0x4f   :  { %2120 = vmatpush1.bf16.msra.mxu0 %v3002_v16 }
  0x50   :  { %2152 = vmatpush1.bf16.msra.mxu1 %v3006_v19  ;;  %2122 = vmatprep.subr.bf16.mxu0 %v3008_v20 }
  0x51   :  { %2154 = vmatprep.subr.bf16.mxu1 %v3011_v25 }
  0x53   :  { %2124 = vmatpush1.bf16.msra.mxu0 %v3014_v34 }
  0x54   :  { %2156 = vmatpush1.bf16.msra.mxu1 %v3018_v36  ;;  %2126 = vmatprep.subr.bf16.mxu0 %v3020_v37 }
  0x55   :  { %2158 = vmatprep.subr.bf16.mxu1 %v3023_v42 }
  0x57   :  { %2128 = vmatpush1.bf16.msra.mxu0 %v3026_v46 }
  0x58   :  { %2160 = vmatpush1.bf16.msra.mxu1 %v3030_v47  ;;  %2162 = vmatprep.subr.bf16.mxu0 %v2939_v4 }
  0x59   :  { %2194 = vmatprep.subr.bf16.mxu1 %v2941_v8 }
  0x5a   :  { %194 = vmatmul.mubr.f32.vlgmr.msra.gmra.mrb[0].mxu0 %v2870_v0 }
  0x5b   :  { %265 = vmatmul.mubr.f32.vlgmr.msra.gmra.mrb[0].mxu1 %v2870_v0  ;;  %2164 = vmatpush1.bf16.msra.mxu0 %v2943_v9 }
  0x5c   :  { %2196 = vmatpush1.bf16.msra.mxu1 %v2946_v13  ;;  %2166 = vmatprep.subr.bf16.mxu0 %v2950_v17 }
  0x5d   :  { %2198 = vmatprep.subr.bf16.mxu1 %v2952_v18  ;;  %409 = vmatprep.mubr.f32.mxu0 %v2870_v0 }
  0x5e   :  { %480 = vmatprep.mubr.f32.mxu1 %v2870_v0 }
  0x5f   :  { %2168 = vmatpush1.bf16.msra.mxu0 %v2955_v22 }
  0x60   :  { %2200 = vmatpush1.bf16.msra.mxu1 %v2959_v26  ;;  %2170 = vmatprep.subr.bf16.mxu0 %v2961_v27 }
  0x61   :  { %2202 = vmatprep.subr.bf16.mxu1 %v2963_v31 }
  0x63   :  { %2172 = vmatpush1.bf16.msra.mxu0 %v2966_v35 }
  0x64   :  { %2204 = vmatpush1.bf16.msra.mxu1 %v2970_v39  ;;  %2174 = vmatprep.subr.bf16.mxu0 %v2972_v40 }
  0x65   :  { %2206 = vmatprep.subr.bf16.mxu1 %v2975_v44 }
  0x67   :  { %2176 = vmatpush1.bf16.msra.mxu0 %v2978_v51 }
  0x68   :  { %2208 = vmatpush1.bf16.msra.mxu1 %v2982_v52  ;;  %2178 = vmatprep.subr.bf16.mxu0 %v2984_v53 }
  0x69   :  { %2210 = vmatprep.subr.bf16.mxu1 %v2987_v57 }
  0x6b   :  { %2180 = vmatpush1.bf16.msra.mxu0 %v2990_v63 }
  0x6c   :  { %2212 = vmatpush1.bf16.msra.mxu1 %v2994_v1  ;;  %2182 = vmatprep.subr.bf16.mxu0 %v2996_v2 }
  0x6d   :  { %2214 = vmatprep.subr.bf16.mxu1 %v2999_v7 }
  0x6f   :  { %2184 = vmatpush1.bf16.msra.mxu0 %v3002_v16 }
  0x70   :  { %2216 = vmatpush1.bf16.msra.mxu1 %v3006_v19  ;;  %2186 = vmatprep.subr.bf16.mxu0 %v3008_v20 }
  0x71   :  { %2218 = vmatprep.subr.bf16.mxu1 %v3011_v25 }
  0x73   :  { %2188 = vmatpush1.bf16.msra.mxu0 %v3014_v34 }
  0x74   :  { %2220 = vmatpush1.bf16.msra.mxu1 %v3018_v36  ;;  %2190 = vmatprep.subr.bf16.mxu0 %v3020_v37 }
  0x75   :  { %2222 = vmatprep.subr.bf16.mxu1 %v3023_v42 }
  0x77   :  { %2192 = vmatpush1.bf16.msra.mxu0 %v3026_v46 }
  0x78   :  { %2224 = vmatpush1.bf16.msra.mxu1 %v3030_v47  ;;  %2226 = vmatprep.subr.bf16.mxu0 %v2939_v4 }
  0x79   :  { %2258 = vmatprep.subr.bf16.mxu1 %v2941_v8 }
 0x12d   :  { %v195_v56 = vpop.f32.mrb[0].mxu0 }
 0x12e   :  { %v266_v59 = vpop.f32.mrb[0].mxu1  ;;  %v197_v60 = vpop.f32.mrb[1].mxu0 }
 0x12f   :  { %v275_v61 = vcombine.low %v195_v56, %v197_v60  ;;  %v268_v62 = vpop.f32.mrb[1].mxu1 }
 0x130   :  { %v276_v3 = vcombine.low %v266_v59, %v268_v62 }
 0x131   :  { %v283_v5 = vrot.slane %v275_v61, %v3073_v58 }
 0x132   :  { %v290_v11 = vrot.slane %v276_v3, %v3073_v58 }
 0x134   :  { %v291_v14 = vcombine.low %v283_v5, %v290_v11 }
 0x136   :  { %v298_v15 = vrot.slane %v291_v14, %v3073_v58  ;;  %v340_v14 = vld [vmem:[%s339_s16] sm:$0xf] }
 0x138   :  { %v300_v21 = vadd.f32 %v298_v15, %v128_v12  ;;  %v343_v15 = vld [vmem:[%s342_s17] sm:$0xf]  ;;  %s1195_s17 = scalar_lea.vmem %s3479_s1, %s2006_s21  ;;  %s1412_s21 = scalar_lea.vmem [#allocation5], %s1998_s12 }
 0x13a   :  { %v1993_v23 = vmul.f32 -1.442695, %v300_v21  ;;  %v308_v24 = vrot.slane %v300_v21, 1  ;;  %v319_v29 = vrot.slane %v300_v21, 3  ;;  %v316_v33 = vrot.slane %v300_v21, 2 }
 0x13c   :  { %2645 = vpow2.f32 %v1993_v23  ;;  %v1994_v28 = vmul.f32 -1.442695, %v308_v24  ;;  %v1995_v30 = vmul.f32 -1.442695, %v319_v29  ;;  %v344_v24 = vadd.f32 %v343_v15, %v340_v14 }
 0x13e   :  { %2647 = vpow2.f32 %v1994_v28 }
 0x13f   :  { %2649 = vpow2.f32 %v1995_v30 }
 0x146   :  { %v2646_v32 = vpop.eup %2645 }
 0x147   :  { %v304_v38 = vadd.f32 1.0, %v2646_v32 }
 0x148   :  { %v2648_v41 = vpop.eup %2647 }
 0x149   :  { %2651 = vrcp.f32 %v304_v38  ;;  %v313_v43 = vadd.f32 1.0, %v2648_v41  ;;  %v2650_v45 = vpop.eup %2649 }
 0x14a   :  { %2653 = vtanh.f32 %v316_v33  ;;  %v324_v54 = vadd.f32 1.0, %v2650_v45 }
 0x14b   :  { %2655 = vrcp.f32 %v313_v43 }
 0x14c   :  { %2657 = vrcp.f32 %v324_v54 }
 0x153   :  { %v2652_v48 = vpop.eup %2651 }
 0x154   :  { %v2654_v49 = vpop.eup %2653 }
 0x155   :  { %v2656_v50 = vpop.eup %2655  ;;  %v328_v56 = vmul.f32 %v2654_v49, %v2652_v48 }
 0x156   :  { %v327_v55 = vmul.f32 0.0, %v2656_v50  ;;  %v2658_v60 = vpop.eup %2657 }
 0x158   :  { %v3081_v59 = vadd.f32 %v328_v56, %v327_v55 }
 0x15a   :  { %2659 = vtanh.f32 %v3081_v59 }
 0x164   :  { %v2660_v61 = vpop.eup %2659 }
 0x165   :  { %v331_v62 = vmul.f32 %v2660_v61, %v2658_v60 }
 0x167   :  { %333 = vst.msk [vmem:[#allocation2] sm:$0x1] %vm332_vm0, %v331_v62  ;;  %410 = vmatmul.mubr.f32.vlgmr.msra.gmra.mrb[2].mxu0 %v331_v62  ;;  %481 = vmatmul.mubr.f32.vlgmr.msra.gmra.mrb[2].mxu1 %v331_v62 }
 0x168   :  { %335 = vst.msk [vmem:[#allocation2 + $0x7] sm:$0x1] %vm334_vm1, %v331_v62  ;;  %2228 = vmatpush1.bf16.msra.mxu0 %v2943_v9  ;;  %2260 = vmatpush1.bf16.msra.mxu1 %v2946_v13 }
 0x169   :  { %2230 = vmatprep.subr.bf16.mxu0 %v2950_v17  ;;  %2262 = vmatprep.subr.bf16.mxu1 %v2952_v18 }
 0x16a   :  { %623 = vmatprep.mubr.f32.mxu0 %v2870_v0  ;;  %694 = vmatprep.mubr.f32.mxu1 %v2870_v0 }
 0x16c   :  { %2232 = vmatpush1.bf16.msra.mxu0 %v2955_v22  ;;  %2264 = vmatpush1.bf16.msra.mxu1 %v2959_v26 }
 0x16d   :  { %2234 = vmatprep.subr.bf16.mxu0 %v2961_v27  ;;  %2266 = vmatprep.subr.bf16.mxu1 %v2963_v31 }
 0x170   :  { %2236 = vmatpush1.bf16.msra.mxu0 %v2966_v35  ;;  %2268 = vmatpush1.bf16.msra.mxu1 %v2970_v39 }
 0x171   :  { %2238 = vmatprep.subr.bf16.mxu0 %v2972_v40  ;;  %2270 = vmatprep.subr.bf16.mxu1 %v2975_v44 }
 0x174   :  { %2240 = vmatpush1.bf16.msra.mxu0 %v2978_v51  ;;  %2272 = vmatpush1.bf16.msra.mxu1 %v2982_v52 }
 0x175   :  { %2242 = vmatprep.subr.bf16.mxu0 %v2984_v53  ;;  %2274 = vmatprep.subr.bf16.mxu1 %v2987_v57 }
 0x178   :  { %2244 = vmatpush1.bf16.msra.mxu0 %v2990_v63  ;;  %2276 = vmatpush1.bf16.msra.mxu1 %v2994_v1 }
 0x179   :  { %2246 = vmatprep.subr.bf16.mxu0 %v2996_v2  ;;  %2278 = vmatprep.subr.bf16.mxu1 %v2999_v7 }
 0x17c   :  { %2248 = vmatpush1.bf16.msra.mxu0 %v3002_v16  ;;  %2280 = vmatpush1.bf16.msra.mxu1 %v3006_v19 }
 0x17d   :  { %2250 = vmatprep.subr.bf16.mxu0 %v3008_v20  ;;  %2282 = vmatprep.subr.bf16.mxu1 %v3011_v25 }
 0x180   :  { %2252 = vmatpush1.bf16.msra.mxu0 %v3014_v34  ;;  %2284 = vmatpush1.bf16.msra.mxu1 %v3018_v36 }
 0x181   :  { %2254 = vmatprep.subr.bf16.mxu0 %v3020_v37  ;;  %2286 = vmatprep.subr.bf16.mxu1 %v3023_v42 }
 0x184   :  { %2256 = vmatpush1.bf16.msra.mxu0 %v3026_v46  ;;  %2288 = vmatpush1.bf16.msra.mxu1 %v3030_v47 }
 0x185   :  { %2290 = vmatprep.subr.bf16.mxu0 %v2939_v4  ;;  %2322 = vmatprep.subr.bf16.mxu1 %v2941_v8 }
 0x23a   :  { %v411_v3 = vpop.f32.mrb[2].mxu0  ;;  %v482_v5 = vpop.f32.mrb[2].mxu1 }
 0x23b   :  { %v413_v6 = vpop.f32.mrb[3].mxu0  ;;  %v484_v10 = vpop.f32.mrb[3].mxu1 }
 0x23c   :  { %v491_v11 = vcombine.low %v411_v3, %v413_v6  ;;  %v492_v12 = vcombine.low %v482_v5, %v484_v10 }
 0x23e   :  { %v499_v21 = vrot.slane %v491_v11, %v3073_v58  ;;  %v506_v23 = vrot.slane %v492_v12, %v3073_v58 }
 0x240   :  { %v507_v28 = vcombine.low %v499_v21, %v506_v23 }
 0x242   :  { %v514_v29 = vrot.slane %v507_v28, %v3073_v58  ;;  %v554_v28 = vld [vmem:[%s553_s24] sm:$0xf]  ;;  %s2038_s24 = sld [smem:[#allocation4 + $0x7]] }
 0x244   :  { %v516_v30 = vadd.f32 %v514_v29, %v344_v24  ;;  %v557_v29 = vld [vmem:[%s556_s2] sm:$0xf]  ;;  %s1621_s2 = sld [smem:[#allocation4]] }
 0x246   :  { %v2000_v32 = vmul.f32 -1.442695, %v516_v30  ;;  %v524_v33 = vrot.slane %v516_v30, 1  ;;  %v535_v41 = vrot.slane %v516_v30, 3  ;;  %v532_v48 = vrot.slane %v516_v30, 2 }
 0x248   :  { %2661 = vpow2.f32 %v2000_v32  ;;  %v2001_v38 = vmul.f32 -1.442695, %v524_v33  ;;  %v2002_v43 = vmul.f32 -1.442695, %v535_v41  ;;  %v558_v33 = vadd.f32 %v557_v29, %v554_v28  ;;  %s2039_s25 = sshll.u32 %s2038_s24, 2 }
 0x249   :  { %s1623_s0 = scalar_lea.vmem %s3479_s1, %s2039_s25 }
 0x24a   :  { %2663 = vpow2.f32 %v2001_v38  ;;  %s2040_s26 = sshll.u32 %s1621_s2, 2 }
 0x24b   :  { %2665 = vpow2.f32 %v2002_v43 }
 0x252   :  { %v2662_v45 = vpop.eup %2661 }
 0x253   :  { %v520_v49 = vadd.f32 1.0, %v2662_v45 }
 0x254   :  { %v2664_v50 = vpop.eup %2663 }
 0x255   :  { %2667 = vrcp.f32 %v520_v49  ;;  %v529_v54 = vadd.f32 1.0, %v2664_v50  ;;  %v2666_v55 = vpop.eup %2665 }
 0x256   :  { %2669 = vtanh.f32 %v532_v48  ;;  %v540_v62 = vadd.f32 1.0, %v2666_v55 }
 0x257   :  { %2671 = vrcp.f32 %v529_v54 }
 0x258   :  { %2673 = vrcp.f32 %v540_v62 }
 0x25f   :  { %v2668_v56 = vpop.eup %2667 }
 0x260   :  { %v2670_v60 = vpop.eup %2669 }
 0x261   :  { %v2672_v61 = vpop.eup %2671  ;;  %v544_v5 = vmul.f32 %v2670_v60, %v2668_v56 }
 0x262   :  { %v543_v3 = vmul.f32 %v2672_v61, %v3081_v59  ;;  %v2674_v10 = vpop.eup %2673 }
 0x264   :  { %v3137_v6 = vadd.f32 %v544_v5, %v543_v3 }
 0x266   :  { %2675 = vtanh.f32 %v3137_v6 }
 0x270   :  { %v2676_v11 = vpop.eup %2675 }
 0x271   :  { %v547_v12 = vmul.f32 %v2676_v11, %v2674_v10 }
 0x273   :  { %548 = vst.msk [vmem:[#allocation2 + $0x1] sm:$0x1] %vm332_vm0, %v547_v12  ;;  %624 = vmatmul.mubr.f32.vlgmr.msra.gmra.mrb[4].mxu0 %v547_v12  ;;  %695 = vmatmul.mubr.f32.vlgmr.msra.gmra.mrb[4].mxu1 %v547_v12 }
 0x274   :  { %549 = vst.msk [vmem:[#allocation2 + $0x6] sm:$0x1] %vm334_vm1, %v547_v12  ;;  %2292 = vmatpush1.bf16.msra.mxu0 %v2943_v9  ;;  %2324 = vmatpush1.bf16.msra.mxu1 %v2946_v13 }
 0x275   :  { %2294 = vmatprep.subr.bf16.mxu0 %v2950_v17  ;;  %2326 = vmatprep.subr.bf16.mxu1 %v2952_v18 }
 0x276   :  { %837 = vmatprep.mubr.f32.mxu0 %v2870_v0  ;;  %908 = vmatprep.mubr.f32.mxu1 %v2870_v0 }
 0x278   :  { %2296 = vmatpush1.bf16.msra.mxu0 %v2955_v22  ;;  %2328 = vmatpush1.bf16.msra.mxu1 %v2959_v26 }
 0x279   :  { %2298 = vmatprep.subr.bf16.mxu0 %v2961_v27  ;;  %2330 = vmatprep.subr.bf16.mxu1 %v2963_v31 }
 0x27c   :  { %2300 = vmatpush1.bf16.msra.mxu0 %v2966_v35  ;;  %2332 = vmatpush1.bf16.msra.mxu1 %v2970_v39 }
 0x27d   :  { %2302 = vmatprep.subr.bf16.mxu0 %v2972_v40  ;;  %2334 = vmatprep.subr.bf16.mxu1 %v2975_v44 }
 0x280   :  { %2304 = vmatpush1.bf16.msra.mxu0 %v2978_v51  ;;  %2336 = vmatpush1.bf16.msra.mxu1 %v2982_v52 }
 0x281   :  { %2306 = vmatprep.subr.bf16.mxu0 %v2984_v53  ;;  %2338 = vmatprep.subr.bf16.mxu1 %v2987_v57 }
 0x284   :  { %2308 = vmatpush1.bf16.msra.mxu0 %v2990_v63  ;;  %2340 = vmatpush1.bf16.msra.mxu1 %v2994_v1 }
 0x285   :  { %2310 = vmatprep.subr.bf16.mxu0 %v2996_v2  ;;  %2342 = vmatprep.subr.bf16.mxu1 %v2999_v7 }
 0x288   :  { %2312 = vmatpush1.bf16.msra.mxu0 %v3002_v16  ;;  %2344 = vmatpush1.bf16.msra.mxu1 %v3006_v19 }
 0x289   :  { %2314 = vmatprep.subr.bf16.mxu0 %v3008_v20  ;;  %2346 = vmatprep.subr.bf16.mxu1 %v3011_v25 }
 0x28c   :  { %2316 = vmatpush1.bf16.msra.mxu0 %v3014_v34  ;;  %2348 = vmatpush1.bf16.msra.mxu1 %v3018_v36 }
 0x28d   :  { %2318 = vmatprep.subr.bf16.mxu0 %v3020_v37  ;;  %2350 = vmatprep.subr.bf16.mxu1 %v3023_v42 }
 0x290   :  { %2320 = vmatpush1.bf16.msra.mxu0 %v3026_v46  ;;  %2352 = vmatpush1.bf16.msra.mxu1 %v3030_v47 }
 0x291   :  { %2354 = vmatprep.subr.bf16.mxu0 %v2939_v4  ;;  %2386 = vmatprep.subr.bf16.mxu1 %v2941_v8 }
 0x346   :  { %v625_v59 = vpop.f32.mrb[4].mxu0  ;;  %v696_v14 = vpop.f32.mrb[4].mxu1 }
 0x347   :  { %v627_v15 = vpop.f32.mrb[5].mxu0  ;;  %v698_v21 = vpop.f32.mrb[5].mxu1 }
 0x348   :  { %v705_v23 = vcombine.low %v625_v59, %v627_v15  ;;  %v706_v24 = vcombine.low %v696_v14, %v698_v21 }
 0x34a   :  { %v713_v30 = vrot.slane %v705_v23, %v3073_v58  ;;  %v720_v32 = vrot.slane %v706_v24, %v3073_v58 }
 0x34c   :  { %v721_v38 = vcombine.low %v713_v30, %v720_v32 }
 0x34e   :  { %v728_v41 = vrot.slane %v721_v38, %v3073_v58  ;;  %v768_v38 = vld [vmem:[%s767_s29] sm:$0xf]  ;;  %s2874_s29 = smov [#allocation10]  }
 0x350   :  { %v730_v43 = vadd.f32 %v728_v41, %v558_v33  ;;  %v771_v41 = vld [vmem:[%s770_s30] sm:$0xf] }
 0x352   :  { %v2007_v45 = vmul.f32 -1.442695, %v730_v43  ;;  %v738_v48 = vrot.slane %v730_v43, 1  ;;  %v749_v50 = vrot.slane %v730_v43, 3  ;;  %v746_v56 = vrot.slane %v730_v43, 2 }
 0x354   :  { %2677 = vpow2.f32 %v2007_v45  ;;  %v2008_v49 = vmul.f32 -1.442695, %v738_v48  ;;  %v2009_v54 = vmul.f32 -1.442695, %v749_v50  ;;  %v772_v48 = vadd.f32 %v771_v41, %v768_v38 }
 0x356   :  { %2679 = vpow2.f32 %v2008_v49 }
 0x357   :  { %2681 = vpow2.f32 %v2009_v54 }
 0x35e   :  { %v2678_v55 = vpop.eup %2677 }
 0x35f   :  { %v734_v60 = vadd.f32 1.0, %v2678_v55 }
 0x360   :  { %v2680_v61 = vpop.eup %2679 }
 0x361   :  { %2683 = vrcp.f32 %v734_v60  ;;  %v743_v62 = vadd.f32 1.0, %v2680_v61  ;;  %v2682_v3 = vpop.eup %2681 }
 0x362   :  { %2685 = vtanh.f32 %v746_v56  ;;  %v754_v12 = vadd.f32 1.0, %v2682_v3 }
 0x363   :  { %2687 = vrcp.f32 %v743_v62 }
 0x364   :  { %2689 = vrcp.f32 %v754_v12 }
 0x36b   :  { %v2684_v5 = vpop.eup %2683 }
 0x36c   :  { %v2686_v10 = vpop.eup %2685 }
 0x36d   :  { %v2688_v11 = vpop.eup %2687  ;;  %v758_v14 = vmul.f32 %v2686_v10, %v2684_v5 }
 0x36e   :  { %v757_v59 = vmul.f32 %v2688_v11, %v3137_v6  ;;  %v2690_v21 = vpop.eup %2689 }
 0x370   :  { %v3193_v15 = vadd.f32 %v758_v14, %v757_v59 }
 0x372   :  { %2691 = vtanh.f32 %v3193_v15 }
 0x37c   :  { %v2692_v23 = vpop.eup %2691 }
 0x37d   :  { %v761_v24 = vmul.f32 %v2692_v23, %v2690_v21 }
 0x37f   :  { %762 = vst.msk [vmem:[#allocation2 + $0x2] sm:$0x1] %vm332_vm0, %v761_v24  ;;  %838 = vmatmul.mubr.f32.vlgmr.msra.gmra.mrb[6].mxu0 %v761_v24  ;;  %909 = vmatmul.mubr.f32.vlgmr.msra.gmra.mrb[6].mxu1 %v761_v24 }
 0x380   :  { %763 = vst.msk [vmem:[#allocation2 + $0x5] sm:$0x1] %vm334_vm1, %v761_v24  ;;  %2356 = vmatpush1.bf16.msra.mxu0 %v2943_v9  ;;  %2388 = vmatpush1.bf16.msra.mxu1 %v2946_v13 }
 0x381   :  { %2358 = vmatprep.subr.bf16.mxu0 %v2950_v17  ;;  %2390 = vmatprep.subr.bf16.mxu1 %v2952_v18 }
 0x382   :  { %1051 = vmatprep.mubr.f32.mxu0 %v2870_v0  ;;  %1122 = vmatprep.mubr.f32.mxu1 %v2870_v0 }
 0x384   :  { %2360 = vmatpush1.bf16.msra.mxu0 %v2955_v22  ;;  %2392 = vmatpush1.bf16.msra.mxu1 %v2959_v26 }
 0x385   :  { %2362 = vmatprep.subr.bf16.mxu0 %v2961_v27  ;;  %2394 = vmatprep.subr.bf16.mxu1 %v2963_v31 }
 0x388   :  { %2364 = vmatpush1.bf16.msra.mxu0 %v2966_v35  ;;  %2396 = vmatpush1.bf16.msra.mxu1 %v2970_v39 }
 0x389   :  { %2366 = vmatprep.subr.bf16.mxu0 %v2972_v40  ;;  %2398 = vmatprep.subr.bf16.mxu1 %v2975_v44 }
 0x38c   :  { %2368 = vmatpush1.bf16.msra.mxu0 %v2978_v51  ;;  %2400 = vmatpush1.bf16.msra.mxu1 %v2982_v52 }
 0x38d   :  { %2370 = vmatprep.subr.bf16.mxu0 %v2984_v53  ;;  %2402 = vmatprep.subr.bf16.mxu1 %v2987_v57 }
 0x390   :  { %2372 = vmatpush1.bf16.msra.mxu0 %v2990_v63  ;;  %2404 = vmatpush1.bf16.msra.mxu1 %v2994_v1 }
 0x391   :  { %2374 = vmatprep.subr.bf16.mxu0 %v2996_v2  ;;  %2406 = vmatprep.subr.bf16.mxu1 %v2999_v7 }
 0x394   :  { %2376 = vmatpush1.bf16.msra.mxu0 %v3002_v16  ;;  %2408 = vmatpush1.bf16.msra.mxu1 %v3006_v19 }
 0x395   :  { %2378 = vmatprep.subr.bf16.mxu0 %v3008_v20  ;;  %2410 = vmatprep.subr.bf16.mxu1 %v3011_v25 }
 0x398   :  { %2380 = vmatpush1.bf16.msra.mxu0 %v3014_v34  ;;  %2412 = vmatpush1.bf16.msra.mxu1 %v3018_v36 }
 0x399   :  { %2382 = vmatprep.subr.bf16.mxu0 %v3020_v37  ;;  %2414 = vmatprep.subr.bf16.mxu1 %v3023_v42 }
 0x39c   :  { %2384 = vmatpush1.bf16.msra.mxu0 %v3026_v46  ;;  %2416 = vmatpush1.bf16.msra.mxu1 %v3030_v47 }
 0x39d   :  { %2418 = vmatprep.subr.bf16.mxu0 %v2939_v4  ;;  %2450 = vmatprep.subr.bf16.mxu1 %v2941_v8 }
 0x452   :  { %v839_v6 = vpop.f32.mrb[6].mxu0  ;;  %v910_v28 = vpop.f32.mrb[6].mxu1 }
 0x453   :  { %v841_v29 = vpop.f32.mrb[7].mxu0  ;;  %v912_v30 = vpop.f32.mrb[7].mxu1 }
 0x454   :  { %v919_v32 = vcombine.low %v839_v6, %v841_v29  ;;  %v920_v33 = vcombine.low %v910_v28, %v912_v30 }
 0x456   :  { %v927_v43 = vrot.slane %v919_v32, %v3073_v58  ;;  %v934_v45 = vrot.slane %v920_v33, %v3073_v58 }
 0x458   :  { %v935_v49 = vcombine.low %v927_v43, %v934_v45 }
 0x45a   :  { %v942_v50 = vrot.slane %v935_v49, %v3073_v58  ;;  %v982_v49 = vld [vmem:[%s981_s9] sm:$0xf] }
 0x45c   :  { %v944_v54 = vadd.f32 %v942_v50, %v772_v48  ;;  %v985_v50 = vld [vmem:[%s984_s14] sm:$0xf] }
 0x45e   :  { %v2014_v55 = vmul.f32 -1.442695, %v944_v54  ;;  %v952_v56 = vrot.slane %v944_v54, 1  ;;  %v963_v61 = vrot.slane %v944_v54, 3  ;;  %v960_v5 = vrot.slane %v944_v54, 2 }
 0x460   :  { %2693 = vpow2.f32 %v2014_v55  ;;  %v2015_v60 = vmul.f32 -1.442695, %v952_v56  ;;  %v2016_v62 = vmul.f32 -1.442695, %v963_v61  ;;  %v986_v56 = vadd.f32 %v985_v50, %v982_v49 }
 0x462   :  { %2695 = vpow2.f32 %v2015_v60 }
 0x463   :  { %2697 = vpow2.f32 %v2016_v62 }
 0x46a   :  { %v2694_v3 = vpop.eup %2693 }
 0x46b   :  { %v948_v10 = vadd.f32 1.0, %v2694_v3 }
 0x46c   :  { %v2696_v11 = vpop.eup %2695 }
 0x46d   :  { %2699 = vrcp.f32 %v948_v10  ;;  %v957_v12 = vadd.f32 1.0, %v2696_v11  ;;  %v2698_v59 = vpop.eup %2697 }
 0x46e   :  { %2701 = vtanh.f32 %v960_v5  ;;  %v968_v24 = vadd.f32 1.0, %v2698_v59 }
 0x46f   :  { %2703 = vrcp.f32 %v957_v12 }
 0x470   :  { %2705 = vrcp.f32 %v968_v24 }
 0x477   :  { %v2700_v14 = vpop.eup %2699 }
 0x478   :  { %v2702_v21 = vpop.eup %2701 }
 0x479   :  { %v2704_v23 = vpop.eup %2703  ;;  %v972_v28 = vmul.f32 %v2702_v21, %v2700_v14 }
 0x47a   :  { %v971_v6 = vmul.f32 %v2704_v23, %v3193_v15  ;;  %v2706_v30 = vpop.eup %2705 }
 0x47c   :  { %v3249_v29 = vadd.f32 %v972_v28, %v971_v6 }
 0x47e   :  { %2707 = vtanh.f32 %v3249_v29 }
 0x488   :  { %v2708_v32 = vpop.eup %2707 }
 0x489   :  { %v975_v33 = vmul.f32 %v2708_v32, %v2706_v30 }
 0x48b   :  { %976 = vst.msk [vmem:[#allocation2 + $0x3] sm:$0x1] %vm332_vm0, %v975_v33  ;;  %1052 = vmatmul.mubr.f32.vlgmr.msra.gmra.mrb[8].mxu0 %v975_v33  ;;  %1123 = vmatmul.mubr.f32.vlgmr.msra.gmra.mrb[8].mxu1 %v975_v33 }
 0x48c   :  { %977 = vst.msk [vmem:[#allocation2 + $0x4] sm:$0x1] %vm334_vm1, %v975_v33  ;;  %2420 = vmatpush1.bf16.msra.mxu0 %v2943_v9  ;;  %2452 = vmatpush1.bf16.msra.mxu1 %v2946_v13 }
 0x48d   :  { %2422 = vmatprep.subr.bf16.mxu0 %v2950_v17  ;;  %2454 = vmatprep.subr.bf16.mxu1 %v2952_v18 }
 0x48e   :  { %1265 = vmatprep.mubr.f32.mxu0 %v2870_v0  ;;  %1336 = vmatprep.mubr.f32.mxu1 %v2870_v0 }
 0x490   :  { %2424 = vmatpush1.bf16.msra.mxu0 %v2955_v22  ;;  %2456 = vmatpush1.bf16.msra.mxu1 %v2959_v26 }
 0x491   :  { %2426 = vmatprep.subr.bf16.mxu0 %v2961_v27  ;;  %2458 = vmatprep.subr.bf16.mxu1 %v2963_v31 }
 0x494   :  { %2428 = vmatpush1.bf16.msra.mxu0 %v2966_v35  ;;  %2460 = vmatpush1.bf16.msra.mxu1 %v2970_v39 }
 0x495   :  { %2430 = vmatprep.subr.bf16.mxu0 %v2972_v40  ;;  %2462 = vmatprep.subr.bf16.mxu1 %v2975_v44 }
 0x498   :  { %2432 = vmatpush1.bf16.msra.mxu0 %v2978_v51  ;;  %2464 = vmatpush1.bf16.msra.mxu1 %v2982_v52 }
 0x499   :  { %2434 = vmatprep.subr.bf16.mxu0 %v2984_v53  ;;  %2466 = vmatprep.subr.bf16.mxu1 %v2987_v57 }
 0x49c   :  { %2436 = vmatpush1.bf16.msra.mxu0 %v2990_v63  ;;  %2468 = vmatpush1.bf16.msra.mxu1 %v2994_v1 }
 0x49d   :  { %2438 = vmatprep.subr.bf16.mxu0 %v2996_v2  ;;  %2470 = vmatprep.subr.bf16.mxu1 %v2999_v7 }
 0x4a0   :  { %2440 = vmatpush1.bf16.msra.mxu0 %v3002_v16  ;;  %2472 = vmatpush1.bf16.msra.mxu1 %v3006_v19 }
 0x4a1   :  { %2442 = vmatprep.subr.bf16.mxu0 %v3008_v20  ;;  %2474 = vmatprep.subr.bf16.mxu1 %v3011_v25 }
 0x4a4   :  { %2444 = vmatpush1.bf16.msra.mxu0 %v3014_v34  ;;  %2476 = vmatpush1.bf16.msra.mxu1 %v3018_v36 }
 0x4a5   :  { %2446 = vmatprep.subr.bf16.mxu0 %v3020_v37  ;;  %2478 = vmatprep.subr.bf16.mxu1 %v3023_v42 }
 0x4a8   :  { %2448 = vmatpush1.bf16.msra.mxu0 %v3026_v46  ;;  %2480 = vmatpush1.bf16.msra.mxu1 %v3030_v47 }
 0x4a9   :  { %2482 = vmatprep.subr.bf16.mxu0 %v2939_v4  ;;  %2514 = vmatprep.subr.bf16.mxu1 %v2941_v8 }
 0x55e   :  { %v1053_v15 = vpop.f32.mrb[8].mxu0  ;;  %v1124_v38 = vpop.f32.mrb[8].mxu1 }
 0x55f   :  { %v1055_v41 = vpop.f32.mrb[9].mxu0  ;;  %v1126_v43 = vpop.f32.mrb[9].mxu1 }
 0x560   :  { %v1133_v45 = vcombine.low %v1053_v15, %v1055_v41  ;;  %v1134_v48 = vcombine.low %v1124_v38, %v1126_v43 }
 0x562   :  { %v1141_v54 = vrot.slane %v1133_v45, %v3073_v58  ;;  %v1148_v55 = vrot.slane %v1134_v48, %v3073_v58 }
 0x564   :  { %v1149_v60 = vcombine.low %v1141_v54, %v1148_v55 }
 0x566   :  { %v1156_v61 = vrot.slane %v1149_v60, %v3073_v58  ;;  %v1196_v60 = vld [vmem:[%s1195_s17] sm:$0xf] }
 0x568   :  { %v1158_v62 = vadd.f32 %v1156_v61, %v986_v56  ;;  %v1199_v61 = vld [vmem:[%s1198_s22] sm:$0xf] }
 0x56a   :  { %v2021_v3 = vmul.f32 -1.442695, %v1158_v62  ;;  %v1166_v5 = vrot.slane %v1158_v62, 1  ;;  %v1177_v11 = vrot.slane %v1158_v62, 3  ;;  %v1174_v14 = vrot.slane %v1158_v62, 2 }
 0x56c   :  { %2709 = vpow2.f32 %v2021_v3  ;;  %v2022_v10 = vmul.f32 -1.442695, %v1166_v5  ;;  %v2023_v12 = vmul.f32 -1.442695, %v1177_v11 }
 0x56e   :  { %2711 = vpow2.f32 %v2022_v10 }
 0x56f   :  { %2713 = vpow2.f32 %v2023_v12 }
 0x576   :  { %v2710_v59 = vpop.eup %2709 }
 0x577   :  { %v1162_v21 = vadd.f32 1.0, %v2710_v59 }
 0x578   :  { %v2712_v23 = vpop.eup %2711 }
 0x579   :  { %2715 = vrcp.f32 %v1162_v21  ;;  %v1171_v24 = vadd.f32 1.0, %v2712_v23  ;;  %v2714_v6 = vpop.eup %2713 }
 0x57a   :  { %2717 = vtanh.f32 %v1174_v14  ;;  %v1182_v33 = vadd.f32 1.0, %v2714_v6 }
 0x57b   :  { %2719 = vrcp.f32 %v1171_v24 }
 0x57c   :  { %2721 = vrcp.f32 %v1182_v33 }
 0x583   :  { %v2716_v28 = vpop.eup %2715 }
 0x584   :  { %v2718_v30 = vpop.eup %2717 }
 0x585   :  { %v2720_v32 = vpop.eup %2719  ;;  %v1186_v38 = vmul.f32 %v2718_v30, %v2716_v28 }
 0x586   :  { %v1185_v15 = vmul.f32 %v2720_v32, %v3249_v29  ;;  %v2722_v43 = vpop.eup %2721 }
 0x588   :  { %v3299_v41 = vadd.f32 %v1186_v38, %v1185_v15 }
 0x58a   :  { %2723 = vtanh.f32 %v3299_v41 }
 0x594   :  { %v2724_v45 = vpop.eup %2723 }
 0x595   :  { %v1189_v48 = vmul.f32 %v2724_v45, %v2722_v43 }
 0x597   :  { %1190 = vst.msk [vmem:[#allocation2 + $0x4] sm:$0x1] %vm332_vm0, %v1189_v48  ;;  %1266 = vmatmul.mubr.f32.vlgmr.msra.gmra.mrb[10].mxu0 %v1189_v48  ;;  %1337 = vmatmul.mubr.f32.vlgmr.msra.gmra.mrb[10].mxu1 %v1189_v48 }
 0x598   :  { %1191 = vst.msk [vmem:[#allocation2 + $0x3] sm:$0x1] %vm334_vm1, %v1189_v48  ;;  %2484 = vmatpush1.bf16.msra.mxu0 %v2943_v9  ;;  %2516 = vmatpush1.bf16.msra.mxu1 %v2946_v13 }
 0x599   :  { %2486 = vmatprep.subr.bf16.mxu0 %v2950_v17  ;;  %2518 = vmatprep.subr.bf16.mxu1 %v2952_v18 }
 0x59a   :  { %1479 = vmatprep.mubr.f32.mxu0 %v2870_v0  ;;  %1550 = vmatprep.mubr.f32.mxu1 %v2870_v0 }
 0x59c   :  { %2488 = vmatpush1.bf16.msra.mxu0 %v2955_v22  ;;  %2520 = vmatpush1.bf16.msra.mxu1 %v2959_v26 }
 0x59d   :  { %2490 = vmatprep.subr.bf16.mxu0 %v2961_v27  ;;  %2522 = vmatprep.subr.bf16.mxu1 %v2963_v31 }
 0x5a0   :  { %2492 = vmatpush1.bf16.msra.mxu0 %v2966_v35  ;;  %2524 = vmatpush1.bf16.msra.mxu1 %v2970_v39 }
 0x5a1   :  { %2494 = vmatprep.subr.bf16.mxu0 %v2972_v40  ;;  %2526 = vmatprep.subr.bf16.mxu1 %v2975_v44 }
 0x5a4   :  { %2496 = vmatpush1.bf16.msra.mxu0 %v2978_v51  ;;  %2528 = vmatpush1.bf16.msra.mxu1 %v2982_v52 }
 0x5a5   :  { %2498 = vmatprep.subr.bf16.mxu0 %v2984_v53  ;;  %2530 = vmatprep.subr.bf16.mxu1 %v2987_v57 }
 0x5a8   :  { %2500 = vmatpush1.bf16.msra.mxu0 %v2990_v63  ;;  %2532 = vmatpush1.bf16.msra.mxu1 %v2994_v1 }
 0x5a9   :  { %2502 = vmatprep.subr.bf16.mxu0 %v2996_v2  ;;  %2534 = vmatprep.subr.bf16.mxu1 %v2999_v7 }
 0x5ac   :  { %2504 = vmatpush1.bf16.msra.mxu0 %v3002_v16  ;;  %2536 = vmatpush1.bf16.msra.mxu1 %v3006_v19 }
 0x5ad   :  { %2506 = vmatprep.subr.bf16.mxu0 %v3008_v20  ;;  %2538 = vmatprep.subr.bf16.mxu1 %v3011_v25 }
 0x5b0   :  { %2508 = vmatpush1.bf16.msra.mxu0 %v3014_v34  ;;  %2540 = vmatpush1.bf16.msra.mxu1 %v3018_v36 }
 0x5b1   :  { %2510 = vmatprep.subr.bf16.mxu0 %v3020_v37  ;;  %2542 = vmatprep.subr.bf16.mxu1 %v3023_v42 }
 0x5b4   :  { %2512 = vmatpush1.bf16.msra.mxu0 %v3026_v46  ;;  %2544 = vmatpush1.bf16.msra.mxu1 %v3030_v47 }
 0x5b5   :  { %2546 = vmatprep.subr.bf16.mxu0 %v2939_v4  ;;  %2578 = vmatprep.subr.bf16.mxu1 %v2941_v8  ;;  %v1200_v8 = vadd.f32 %v1199_v61, %v1196_v60 }
 0x66a   :  { %v1267_v29 = vpop.f32.mrb[10].mxu0  ;;  %v1338_v49 = vpop.f32.mrb[10].mxu1 }
 0x66b   :  { %v1269_v50 = vpop.f32.mrb[11].mxu0  ;;  %v1340_v54 = vpop.f32.mrb[11].mxu1 }
 0x66c   :  { %v1347_v55 = vcombine.low %v1267_v29, %v1269_v50  ;;  %v1348_v56 = vcombine.low %v1338_v49, %v1340_v54 }
 0x66e   :  { %v1355_v62 = vrot.slane %v1347_v55, %v3073_v58  ;;  %v1362_v4 = vrot.slane %v1348_v56, %v3073_v58 }
 0x670   :  { %v1363_v3 = vcombine.low %v1355_v62, %v1362_v4  ;;  %v1835_v62 = vld [vmem:[%s3482_s4] sm:$0xff]  ;;  %v1836_v4 = vld [vmem:[%s3482_s4 + $0x8] sm:$0xff] }
 0x672   :  { %v1370_v5 = vrot.slane %v1363_v3, %v3073_v58  ;;  %v2872_v3 = vmov 0.0|0.0  }
 0x674   :  { %v1372_v10 = vadd.f32 %v1370_v5, %v1200_v8  ;;  %v2610_v8 = vpack.c.bf16 %v1836_v4, %v1835_v62  ;;  %v1837_v5 = vld [vmem:[%s3482_s4 + $0x10] sm:$0xff] }
 0x676   :  { %v2028_v11 = vmul.f32 -1.442695, %v1372_v10  ;;  %v1380_v12 = vrot.slane %v1372_v10, 1  ;;  %v1391_v14 = vrot.slane %v1372_v10, 3  ;;  %v1388_v24 = vrot.slane %v1372_v10, 2  ;;  %v1838_v10 = vld [vmem:[%s3482_s4 + $0x18] sm:$0xff] }
 0x678   :  { %2725 = vpow2.f32 %v2028_v11  ;;  %v2029_v59 = vmul.f32 -1.442695, %v1380_v12  ;;  %v2030_v21 = vmul.f32 -1.442695, %v1391_v14  ;;  %v2613_v11 = vpack.c.bf16 %v1838_v10, %v1837_v5  ;;  %v1839_v12 = vld [vmem:[%s3482_s4 + $0x20] sm:$0xff] }
 0x67a   :  { %2727 = vpow2.f32 %v2029_v59  ;;  %v1840_v59 = vld [vmem:[%s3482_s4 + $0x28] sm:$0xff] }
 0x67b   :  { %2729 = vpow2.f32 %v2030_v21  ;;  %v2616_v14 = vpack.c.bf16 %v1840_v59, %v1839_v12  ;;  %v1841_v21 = vld [vmem:[%s3482_s4 + $0x30] sm:$0xff] }
 0x682   :  { %v2726_v23 = vpop.eup %2725 }
 0x683   :  { %v1376_v6 = vadd.f32 1.0, %v2726_v23  ;;  %v1842_v23 = vld [vmem:[%s3482_s4 + $0x38] sm:$0xff] }
 0x684   :  { %v2728_v28 = vpop.eup %2727 }
 0x685   :  { %2731 = vrcp.f32 %v1376_v6  ;;  %v1385_v30 = vadd.f32 1.0, %v2728_v28  ;;  %v2730_v32 = vpop.eup %2729  ;;  %v1843_v6 = vld [vmem:[%s3482_s4 + $0x40] sm:$0xff]  ;;  %v1844_v28 = vld [vmem:[%s3482_s4 + $0x48] sm:$0xff] }
 0x686   :  { %2733 = vtanh.f32 %v1388_v24  ;;  %v1396_v43 = vadd.f32 1.0, %v2730_v32  ;;  %v2619_v24 = vpack.c.bf16 %v1842_v23, %v1841_v21  ;;  %v1845_v32 = vld [vmem:[%s3482_s4 + $0x50] sm:$0xff] }
 0x687   :  { %2735 = vrcp.f32 %v1385_v30  ;;  %v2622_v30 = vpack.c.bf16 %v1844_v28, %v1843_v6 }
 0x688   :  { %2737 = vrcp.f32 %v1396_v43  ;;  %v1848_v43 = vld [vmem:[%s3482_s4 + $0x68] sm:$0xff] }
 0x68f   :  { %v2732_v33 = vpop.eup %2731 }
 0x690   :  { %v2734_v15 = vpop.eup %2733 }
 0x691   :  { %v2736_v38 = vpop.eup %2735  ;;  %v1400_v48 = vmul.f32 %v2734_v15, %v2732_v33  ;;  %v1846_v33 = vld [vmem:[%s3482_s4 + $0x58] sm:$0xff] }
 0x692   :  { %v1399_v45 = vmul.f32 %v2736_v38, %v3299_v41  ;;  %v2738_v49 = vpop.eup %2737  ;;  %v2625_v15 = vpack.c.bf16 %v1846_v33, %v1845_v32  ;;  %v1847_v38 = vld [vmem:[%s3482_s4 + $0x60] sm:$0xff] }
 0x694   :  { %v3349_v29 = vadd.f32 %v1400_v48, %v1399_v45  ;;  %v2628_v45 = vpack.c.bf16 %v1848_v43, %v1847_v38  ;;  %v1849_v48 = vld [vmem:[%s3482_s4 + $0x70] sm:$0xff] }
 0x696   :  { %2739 = vtanh.f32 %v3349_v29 }
 0x6a0   :  { %v2740_v50 = vpop.eup %2739 }
 0x6a1   :  { %v1403_v54 = vmul.f32 %v2740_v50, %v2738_v49 }
 0x6a3   :  { %1404 = vst.msk [vmem:[#allocation2 + $0x5] sm:$0x1] %vm332_vm0, %v1403_v54  ;;  %1480 = vmatmul.mubr.f32.vlgmr.msra.gmra.mrb[12].mxu0 %v1403_v54  ;;  %1551 = vmatmul.mubr.f32.vlgmr.msra.gmra.mrb[12].mxu1 %v1403_v54 }
 0x6a4   :  { %1405 = vst.msk [vmem:[#allocation2 + $0x2] sm:$0x1] %vm334_vm1, %v1403_v54  ;;  %2548 = vmatpush1.bf16.msra.mxu0 %v2943_v9  ;;  %2580 = vmatpush1.bf16.msra.mxu1 %v2946_v13 }
 0x6a5   :  { %2550 = vmatprep.subr.bf16.mxu0 %v2950_v17  ;;  %2582 = vmatprep.subr.bf16.mxu1 %v2952_v18 }
 0x6a6   :  { %1693 = vmatprep.mubr.f32.mxu0 %v2870_v0  ;;  %1764 = vmatprep.mubr.f32.mxu1 %v2870_v0 }
 0x6a8   :  { %2552 = vmatpush1.bf16.msra.mxu0 %v2955_v22  ;;  %2584 = vmatpush1.bf16.msra.mxu1 %v2959_v26 }
 0x6a9   :  { %2554 = vmatprep.subr.bf16.mxu0 %v2961_v27  ;;  %2586 = vmatprep.subr.bf16.mxu1 %v2963_v31  ;;  %v1410_v27 = vld [vmem:[%s1409_s20] sm:$0xf] }
 0x6aa   :  { %v1413_v31 = vld [vmem:[%s1412_s21] sm:$0xf] }
 0x6ac   :  { %2556 = vmatpush1.bf16.msra.mxu0 %v2966_v35  ;;  %2588 = vmatpush1.bf16.msra.mxu1 %v2970_v39 }
 0x6ad   :  { %2558 = vmatprep.subr.bf16.mxu0 %v2972_v40  ;;  %2590 = vmatprep.subr.bf16.mxu1 %v2975_v44  ;;  %v1414_v40 = vadd.f32 %v1413_v31, %v1410_v27 }
 0x6b0   :  { %2560 = vmatpush1.bf16.msra.mxu0 %v2978_v51  ;;  %2592 = vmatpush1.bf16.msra.mxu1 %v2982_v52 }
 0x6b1   :  { %2562 = vmatprep.subr.bf16.mxu0 %v2984_v53  ;;  %2594 = vmatprep.subr.bf16.mxu1 %v2987_v57 }
 0x6b4   :  { %2564 = vmatpush1.bf16.msra.mxu0 %v2990_v63  ;;  %2596 = vmatpush1.bf16.msra.mxu1 %v2994_v1 }
 0x6b5   :  { %2566 = vmatprep.subr.bf16.mxu0 %v2996_v2  ;;  %2598 = vmatprep.subr.bf16.mxu1 %v2999_v7 }
 0x6b8   :  { %2568 = vmatpush1.bf16.msra.mxu0 %v3002_v16  ;;  %2600 = vmatpush1.bf16.msra.mxu1 %v3006_v19 }
 0x6b9   :  { %2570 = vmatprep.subr.bf16.mxu0 %v3008_v20  ;;  %2602 = vmatprep.subr.bf16.mxu1 %v3011_v25 }
 0x6bc   :  { %2572 = vmatpush1.bf16.msra.mxu0 %v3014_v34  ;;  %2604 = vmatpush1.bf16.msra.mxu1 %v3018_v36 }
 0x6bd   :  { %2574 = vmatprep.subr.bf16.mxu0 %v3020_v37  ;;  %2606 = vmatprep.subr.bf16.mxu1 %v3023_v42 }
 0x6c0   :  { %2576 = vmatpush1.bf16.msra.mxu0 %v3026_v46  ;;  %2608 = vmatpush1.bf16.msra.mxu1 %v3030_v47 }
 0x6c1   :  { %2609 = vmatprep.subr.bf16.mxu0 %v2872_v3 }
 0x776   :  { %v1481_v9 = vpop.f32.mrb[12].mxu0  ;;  %v1552_v13 = vpop.f32.mrb[12].mxu1 }
 0x777   :  { %v1483_v17 = vpop.f32.mrb[13].mxu0  ;;  %v1554_v18 = vpop.f32.mrb[13].mxu1 }
 0x778   :  { %v1561_v22 = vcombine.low %v1481_v9, %v1483_v17  ;;  %v1562_v26 = vcombine.low %v1552_v13, %v1554_v18 }
 0x77a   :  { %v1569_v35 = vrot.slane %v1561_v22, %v3073_v58  ;;  %v1576_v39 = vrot.slane %v1562_v26, %v3073_v58  ;;  %v1624_v22 = vld [vmem:[%s1623_s0] sm:$0xf] }
 0x77c   :  { %v1577_v44 = vcombine.low %v1569_v35, %v1576_v39 }
 0x77e   :  { %v1584_v51 = vrot.slane %v1577_v44, %v3073_v58 }
 0x780   :  { %v1586_v52 = vadd.f32 %v1584_v51, %v1414_v40 }
 0x782   :  { %v2035_v53 = vmul.f32 -1.442695, %v1586_v52  ;;  %v1594_v57 = vrot.slane %v1586_v52, 1  ;;  %v1605_v1 = vrot.slane %v1586_v52, 3  ;;  %v1602_v16 = vrot.slane %v1586_v52, 2 }
 0x784   :  { %2741 = vpow2.f32 %v2035_v53  ;;  %v2036_v63 = vmul.f32 -1.442695, %v1594_v57  ;;  %v2037_v2 = vmul.f32 -1.442695, %v1605_v1 }
 0x786   :  { %2743 = vpow2.f32 %v2036_v63 }
 0x787   :  { %2745 = vpow2.f32 %v2037_v2 }
 0x78e   :  { %v2742_v7 = vpop.eup %2741 }
 0x78f   :  { %v1590_v19 = vadd.f32 1.0, %v2742_v7 }
 0x790   :  { %v2744_v20 = vpop.eup %2743 }
 0x791   :  { %2747 = vrcp.f32 %v1590_v19  ;;  %v1599_v25 = vadd.f32 1.0, %v2744_v20  ;;  %v2746_v34 = vpop.eup %2745 }
 0x792   :  { %2749 = vtanh.f32 %v1602_v16  ;;  %v1610_v46 = vadd.f32 1.0, %v2746_v34 }
 0x793   :  { %2751 = vrcp.f32 %v1599_v25 }
 0x794   :  { %2753 = vrcp.f32 %v1610_v46 }
 0x79b   :  { %v2748_v36 = vpop.eup %2747 }
 0x79c   :  { %v2750_v37 = vpop.eup %2749 }
 0x79d   :  { %v2752_v42 = vpop.eup %2751  ;;  %v1614_v41 = vmul.f32 %v2750_v37, %v2748_v36 }
 0x79e   :  { %v1613_v47 = vmul.f32 %v2752_v42, %v3349_v29  ;;  %v2754_v56 = vpop.eup %2753  ;;  %v1850_v29 = vld [vmem:[%s3482_s4 + $0x78] sm:$0xff]  ;;  %s1626_s4 = scalar_lea.vmem [#allocation5], %s2040_s26 }
 0x79f   :  { %v2631_v49 = vpack.c.bf16 %v1850_v29, %v1849_v48 }
 0x7a0   :  { %v3397_v55 = vadd.f32 %v1614_v41, %v1613_v47 }
 0x7a2   :  { %2755 = vtanh.f32 %v3397_v55 }
 0x7ac   :  { %v2756_v60 = vpop.eup %2755 }
 0x7ad   :  { %v1617_v61 = vmul.f32 %v2756_v60, %v2754_v56  ;;  %v2044_v60 = vld [vmem:[%s3483_s5] ss:$0 sm:$0xff]  ;;  %s1948_s5 = sshll.u32 %s2874_s29, 4  ;;  %s1949_s5 = int_to_ptr.vmem [resolvable:$true] %s1948_s5 }
 0x7ae   :  { %s2833_s30 = scalar_lea.vmem %s1949_s5, 128  ;;  %p2838_p8 = scmp.lt.s32.totalorder %s1949_s5, %s1949_s5 }
 0x7af   :  { %1618 = vst.msk [vmem:[#allocation2 + $0x6] sm:$0x1] %vm332_vm0, %v1617_v61  ;;  %1694 = vmatmul.mubr.f32.vlgmr.msra.gmra.mrb[14].mxu0 %v1617_v61  ;;  %1765 = vmatmul.mubr.f32.vlgmr.msra.gmra.mrb[14].mxu1 %v1617_v61  ;;  %p2834_p7 = scmp.ne.s32.totalorder %s1949_s5, %s2833_s30  ;;  %p2839_p9 = scmp.lt.s32.totalorder %s2833_s30, %s2833_s30 }
 0x7b0   :  { %1619 = vst.msk [vmem:[#allocation2 + $0x1] sm:$0x1] %vm334_vm1, %v1617_v61  ;;  %2611 = vmatpush3.bf16.msra.mxu0 %v2610_v8  ;;  %2094 = vmatprep.mubr.msk.f32.mxu0 %vm2873_vm2, %v2870_v0  ;;  %v1627_v0 = vld [vmem:[%s1626_s4] sm:$0xf] }
 0x7b1   :  { %2612 = vmatprep.subr.bf16.mxu0 %v2872_v3  ;;  %v1628_v31 = vadd.f32 %v1627_v0, %v1624_v22  ;;  %p2840_p10 = por %p2839_p9, %p2838_p8 }
 0x7b3   :  { %p2841_p11 = pnand %p2840_p10, %p2834_p7 }
 0x7b4   :  { %2614 = vmatpush3.bf16.msra.mxu0 %v2613_v11 }
 0x7b5   :  { %2615 = vmatprep.subr.bf16.mxu0 %v2872_v3 }
 0x7b8   :  { %2617 = vmatpush3.bf16.msra.mxu0 %v2616_v14 }
 0x7b9   :  { %2618 = vmatprep.subr.bf16.mxu0 %v2872_v3 }
 0x7bc   :  { %2620 = vmatpush3.bf16.msra.mxu0 %v2619_v24 }
 0x7bd   :  { %2621 = vmatprep.subr.bf16.mxu0 %v2872_v3 }
 0x7c0   :  { %2623 = vmatpush3.bf16.msra.mxu0 %v2622_v30 }
 0x7c1   :  { %2624 = vmatprep.subr.bf16.mxu0 %v2872_v3 }
 0x7c4   :  { %2626 = vmatpush3.bf16.msra.mxu0 %v2625_v15 }
 0x7c5   :  { %2627 = vmatprep.subr.bf16.mxu0 %v2872_v3 }
 0x7c8   :  { %2629 = vmatpush3.bf16.msra.mxu0 %v2628_v45 }
 0x7c9   :  { %2630 = vmatprep.subr.bf16.mxu0 %v2872_v3 }
 0x7cc   :  { %2632 = vmatpush3.bf16.msra.mxu0 %v2631_v49 }
 0x882   :  { %v1695_v50 = vpop.f32.mrb[14].mxu0  ;;  %v1766_v54 = vpop.f32.mrb[14].mxu1 }
 0x883   :  { %v1697_v9 = vpop.f32.mrb[15].mxu0  ;;  %v1768_v13 = vpop.f32.mrb[15].mxu1 }
 0x884   :  { %v1775_v17 = vcombine.low %v1695_v50, %v1697_v9  ;;  %v1776_v18 = vcombine.low %v1766_v54, %v1768_v13 }
 0x886   :  { %v1783_v26 = vrot.slane %v1775_v17, %v3073_v58  ;;  %v1790_v27 = vrot.slane %v1776_v18, %v3073_v58 }
 0x888   :  { %v1791_v35 = vcombine.low %v1783_v26, %v1790_v27 }
 0x88a   :  { %v1798_v39 = vrot.slane %v1791_v35, %v3073_v58 }
 0x88c   :  { %v1800_v40 = vadd.f32 %v1798_v39, %v1628_v31 }
 0x88e   :  { %v2041_v44 = vmul.f32 -1.442695, %v1800_v40  ;;  %v1808_v51 = vrot.slane %v1800_v40, 1  ;;  %v1819_v53 = vrot.slane %v1800_v40, 3  ;;  %v1816_v1 = vrot.slane %v1800_v40, 2 }
 0x890   :  { %2757 = vpow2.f32 %v2041_v44  ;;  %v2042_v52 = vmul.f32 -1.442695, %v1808_v51  ;;  %v2043_v57 = vmul.f32 -1.442695, %v1819_v53 }
 0x892   :  { %2759 = vpow2.f32 %v2042_v52 }
 0x893   :  { %2761 = vpow2.f32 %v2043_v57 }
 0x89a   :  { %v2758_v63 = vpop.eup %2757 }
 0x89b   :  { %v1804_v2 = vadd.f32 1.0, %v2758_v63 }
 0x89c   :  { %v2760_v7 = vpop.eup %2759 }
 0x89d   :  { %2763 = vrcp.f32 %v1804_v2  ;;  %v1813_v16 = vadd.f32 1.0, %v2760_v7  ;;  %v2762_v19 = vpop.eup %2761 }
 0x89e   :  { %2765 = vtanh.f32 %v1816_v1  ;;  %v1824_v34 = vadd.f32 1.0, %v2762_v19 }
 0x89f   :  { %2767 = vrcp.f32 %v1813_v16 }
 0x8a0   :  { %2769 = vrcp.f32 %v1824_v34 }
 0x8a7   :  { %v2764_v20 = vpop.eup %2763 }
 0x8a8   :  { %v2766_v58 = vpop.eup %2765 }
 0x8a9   :  { %v2768_v25 = vpop.eup %2767  ;;  %v1828_v37 = vmul.f32 %v2766_v58, %v2764_v20 }
 0x8aa   :  { %v1827_v36 = vmul.f32 %v2768_v25, %v3397_v55  ;;  %v2770_v46 = vpop.eup %2769 }
 0x8ac   :  { %v1829_v42 = vadd.f32 %v1828_v37, %v1827_v36 }
 0x8ae   :  { %2771 = vtanh.f32 %v1829_v42 }
 0x8b8   :  { %v2772_v47 = vpop.eup %2771 }
 0x8b9   :  { %v1831_v41 = vmul.f32 %v2772_v47, %v2770_v46 }
 0x8bb   :  { %1832 = vst.msk [vmem:[#allocation2 + $0x7] sm:$0x1] %vm332_vm0, %v1831_v41 }
 0x8bc   :  { %1833 = vst.msk [vmem:[#allocation2] sm:$0x1] %vm334_vm1, %v1831_v41 }
 0x8c3   :  { %v1834_v56 = vld [vmem:[#allocation2] sm:$0xff] }
 0x8c4   :  { %2095 = vmatmul.mubr.f32.vlgmr.msra.gmra.mrb[16].mxu0 %v1834_v56 }
 0x997   :  { %v1924_v61 = vpop.f32.mrb[16].mxu0 }
 0x998   :  { %v1925_v55 = vadd.f32 %v2044_v60, %v1924_v61  ;;  %v2096_v62 = vpop.f32.mrb[17].mxu0 }
 0x99a   :  { %v1929_v4 = vsel %vm1928_vm3, %v1925_v55, -inf }
 0x99b   :  { %1930 = vmax.xlane.f32.xlu0 %v1929_v4 }
 0xa28   :  { %v1931_v8 = vpop.xlane.xlu0 %1930 }
 0xa29   :  { %v1932_v3 = vsub.f32 %v1925_v55, %v1931_v8 }
 0xa2b   :  { %v1933_v5 = vmul.f32 1.442695, %v1932_v3 }
 0xa2d   :  { %2773 = vpow2.f32 %v1933_v5 }
 0xa37   :  { %v2774_v10 = vpop.eup %2773 }
 0xa38   :  { %v1935_v11 = vsel %vm1928_vm3, %v2774_v10, 0.0 }
 0xa39   :  { %1936 = vadd.xlane.f32.xlu0 %v1935_v11 }
 0xac6   :  { %v1937_v12 = vpop.xlane.xlu0 %1936 }
 0xac7   :  { %2775 = vlog2.f32 %v1937_v12 }
 0xad1   :  { %v2776_v59 = vpop.eup %2775 }
 0xad2   :  { %v1939_v14 = vmul.f32 0.6931472, %v2776_v59 }
 0xad4   :  { %v1940_v21 = vsub.f32 %v1932_v3, %v1939_v14 }
 0xad6   :  { %1941 = vst.msk [vmem:[#allocation10] sm:$0xff] %vm1928_vm3, %v1940_v21 }
 0xad7   :  { %2844 = shalt.err (!%p2841_p11)
}
 0xad8   :  { %s2845_s9 = scalar_lea.hbm %s3484_s6, 128 }
 0xad9   :  { %p2846_p12 = scmp.ne.s32.totalorder %s3484_s6, %s2845_s9  ;;  %p2849_p13 = scmp.lt.u32.totalorder %s2845_s9, %s3484_s6 }
 0xadb   :  { %p2851_p0 = pnand %p2849_p13, %p2846_p12 }
 0xadd   :  { %2854 = shalt.err (!%p2851_p0)
}
 0xade   :  { %1951 = dma.vmem_to_hbm [thread:$0]  %s1949_s5, 128, %s3484_s6, [#allocation7]  }
 0xadf   :  { %2861 = dma.done.wait [#allocation7], 128  }
 0xae0   :  { %2862 = vsyncadd [#allocation7], 4294967168 }
 0xae1   :  { %1955 = vsyncpa [#allocation6], 1 }
 0xae2   :  { %1956 = vsyncpa [#allocation9], 1 }
 0xae3   :  { %1957 = vsyncpa [#allocation7], 1 }

</bundles_post_ra>
